<compile_context>
chip_gen: v5e
topology: v5e:2x2
jax: 0.10.0
libtpu: 0.0.40
codegen_flags: <defaults>
</compile_context>

<pallas_src>
import jax
import jax.numpy as jnp
from jax import lax
from jax.experimental import pallas as pl
from jax.experimental.pallas import tpu as pltpu


def _make_finn_kernel(nx, nxp, steps_per_chunk, pack):
    """Build the per-chunk kernel with static geometry baked in.

    nx    : physical spatial points
    nxp   : spatial working width padded to a multiple of 128 lanes
    steps_per_chunk : trajectory entries produced per grid step (fully unrolled)
    pack  : trajectory entries packed along the 128-lane axis per output row
    """

    def kernel(scal_ref, dt_ref, u0_ref, w1_ref, b1_ref, w2_ref, b2_ref,
               w3_ref, out_ref, state_ref):
        g = pl.program_id(0)

        # Chunk 0: seed the resident Euler state with u0.
        @pl.when(g == 0)
        def _():
            state_ref[...] = u0_ref[...]

        d0 = scal_ref[0]
        d1 = scal_ref[1]
        s0 = scal_ref[2]
        s1 = scal_ref[3]
        bc00 = scal_ref[4]
        bc01 = scal_ref[5]
        ret_scale = scal_ref[6]          # 10**p_exp, precomputed host-side
        dx = scal_ref[7]
        cauchy_mult = scal_ref[8]
        b3 = scal_ref[9]

        # ---- loop-invariant values hoisted out of the unrolled step loop ----
        idx = lax.broadcasted_iota(jnp.int32, (1, nxp), 1)
        is_left = idx == 0
        is_right = idx == nx - 1
        cauchy_coef = d0 * dx * cauchy_mult
        two_s0 = 2.0 * s0

        w1 = w1_ref[...]                                  # (H, 1)
        b1 = b1_ref[...]                                  # (H, 1)
        w2_bf = w2_ref[...].astype(jnp.bfloat16)          # bf16 MXU operand
        b2 = b2_ref[...]                                  # (H, 1)
        w3 = w3_ref[...]                                  # (H, 1)

        u = state_ref[...]                                # (2, nxp): c, ct

        # Fully unrolled chunk of Euler steps (full LLO scheduler visibility).
        for j in range(steps_per_chunk):
            c = u[0:1, :]

            # function_learner MLP: Linear(1,H)+Tanh, Linear(H,H)+Tanh,
            # Linear(H,1)+Sigmoid.  First layer is a broadcasted outer
            # product; output layer is a VPU mul + sublane reduce.
            h1 = jnp.tanh(w1 * c + b1)                    # (H, nxp)
            h2 = jnp.tanh(
                jnp.dot(w2_bf, h1.astype(jnp.bfloat16),
                        preferred_element_type=jnp.float32) + b2)
            o = jax.nn.sigmoid(jnp.sum(w3 * h2, axis=0, keepdims=True) + b3)
            ret = o * ret_scale                           # (1, nxp)

            # Neighbor shifts via XLU rotate; wrap lanes masked below.
            c_m1 = pltpu.roll(c, 1, axis=1)               # c[i-1]
            c_p1 = pltpu.roll(c, nxp - 1, axis=1)         # c[i+1]

            # Cauchy right BC: at i = Nx-1, c_m1 == c[Nx-2].
            right_bc = cauchy_coef * (c_m1 - c)
            c_left_c = jnp.where(is_left, bc00, c_m1)
            c_left_ct = jnp.where(is_left, bc01, c_m1)
            c_right = jnp.where(is_right, right_bc, c_p1)

            # left_flux + right_flux combined algebraically.
            base = two_s0 * c
            flux_c = d0 * ret * (base + s1 * (c_left_c + c_right))
            flux_ct = d1 * (base + s1 * (c_left_ct + c_right))
            flux = jnp.concatenate([flux_c, flux_ct], axis=0)   # (2, nxp)

            # dt == 0 for the very first entry (stores u0) and for padding.
            dt = dt_ref[g * steps_per_chunk + j]
            u = u + dt * flux

            row = j // pack
            off = (j % pack) * nx
            out_ref[:, row:row + 1, off:off + nx] = u[:, :nx].reshape(2, 1, nx)

        state_ref[...] = u               # carry the state to the next chunk

    return kernel


@jax.jit
def finn_diffsorp_forward(t, u, scalars, w1, b1, w2, b2, w3):
    """FINN_DiffSorp.forward: integrate du/dt = state_kernel(u) from u[0] over t.

    t: (T,), u: (T, Nx, 2).  Returns pred: (T, Nx, 2).
    """
    # TODO(synk): torchdiffeq's adaptive odeint replaced by fixed-step explicit
    # Euler on the given time grid (no dt-stability check).
    nt = int(t.shape[0])
    nx = int(u.shape[1])
    h = int(w1.shape[0])

    # ---- static kernel geometry ----
    nxp = max(128, ((nx + 127) // 128) * 128)      # padded working lane width
    pack = 128 // nx if 128 % nx == 0 else 1       # time entries per lane-row
    lane = pack * nx
    rows_needed = -(-nt // pack)
    if rows_needed <= 8:
        rows, n_chunks = rows_needed, 1            # block == full array: OK
    else:
        rows, n_chunks = 8, -(-rows_needed // 8)   # (8, lane) tiled blocks
    steps_per_chunk = rows * pack
    t_pad = n_chunks * steps_per_chunk

    u0 = jnp.zeros((2, nxp), jnp.float32).at[:, :nx].set(
        jnp.transpose(u[0], (1, 0)).astype(jnp.float32))

    # dt_pad[e] advances entry e-1 -> e; dt_pad[0] = 0 so entry 0 stores u0,
    # trailing zeros keep the state constant for padded trajectory slots
    # (also makes the nt == 1 edge case well defined).
    dt_pad = jnp.zeros((t_pad,), jnp.float32)
    if nt > 1:
        dt_pad = dt_pad.at[1:nt].set((t[1:] - t[:-1]).astype(jnp.float32))

    kernel = _make_finn_kernel(nx, nxp, steps_per_chunk, pack)

    out = pl.pallas_call(
        kernel,
        out_shape=jax.ShapeDtypeStruct((2, n_chunks * rows, lane), jnp.float32),
        grid=(n_chunks,),
        in_specs=[
            pl.BlockSpec(memory_space=pltpu.MemorySpace.SMEM),   # scalars
            pl.BlockSpec(memory_space=pltpu.MemorySpace.SMEM),   # dt_pad
            pl.BlockSpec((2, nxp), lambda g: (0, 0)),            # u0
            pl.BlockSpec((h, 1), lambda g: (0, 0)),              # w1
            pl.BlockSpec((h, 1), lambda g: (0, 0)),              # b1
            pl.BlockSpec((h, h), lambda g: (0, 0)),              # w2
            pl.BlockSpec((h, 1), lambda g: (0, 0)),              # b2
            pl.BlockSpec((h, 1), lambda g: (0, 0)),              # w3
        ],
        out_specs=pl.BlockSpec((2, rows, lane), lambda g: (0, g, 0)),
        scratch_shapes=[pltpu.VMEM((2, nxp), jnp.float32)],
        compiler_params=pltpu.CompilerParams(
            dimension_semantics=("arbitrary",)),
    )(scalars, dt_pad, u0, w1, b1, w2, b2, w3)

    # (2, R, pack*nx) -> (T, Nx, 2): pure layout plumbing outside the kernel.
    traj = out.reshape(2, n_chunks * rows, pack, nx)
    traj = jnp.transpose(traj, (1, 2, 3, 0)).reshape(t_pad, nx, 2)
    return traj[:nt]


# ----------------------------- pure-JAX reference ---------------------------
def _ref_state(u_nxv, D, stencil, BC, dx, cauchy_mult, p_exp, w1, b1, w2, b2,
               w3, b3):
    c = u_nxv[:, 0]
    x = c[:, None]
    h1 = jnp.tanh(x @ w1.T + b1)
    h2 = jnp.tanh(h1 @ w2.T + b2)
    ret = (jax.nn.sigmoid(h2 @ w3.T + b3) * (10.0 ** p_exp))[:, 0]
    s0, s1 = stencil[0], stencil[1]
    lb_c = (D[0] * ret[0] * (s0 * c[0] + s1 * BC[0, 0]))[None]
    ln_c = D[0] * ret[1:] * (s0 * c[1:] + s1 * c[:-1])
    lf_c = jnp.concatenate([lb_c, ln_c])
    lb_ct = (D[1] * (s0 * c[0] + s1 * BC[0, 1]))[None]
    ln_ct = D[1] * (s0 * c[1:] + s1 * c[:-1])
    lf_ct = jnp.concatenate([lb_ct, ln_ct])
    rbc = D[0] * dx * (c[-2] - c[-1]) * cauchy_mult
    rb_c = (D[0] * ret[-1] * (s0 * c[-1] + s1 * rbc))[None]
    rn_c = D[0] * ret[:-1] * (s0 * c[:-1] + s1 * c[1:])
    rf_c = jnp.concatenate([rn_c, rb_c])
    rb_ct = (D[1] * (s0 * c[-1] + s1 * rbc))[None]
    rn_ct = D[1] * (s0 * c[:-1] + s1 * c[1:])
    rf_ct = jnp.concatenate([rn_ct, rb_ct])
    return jnp.stack([lf_c + rf_c, lf_ct + rf_ct], axis=1)


def _ref_forward(t, u, D, stencil, BC, dx, cauchy_mult, p_exp, w1, b1, w2, b2,
                 w3, b3):
    u0 = u[0]

    def step(carry, dt):
        new = carry + dt * _ref_state(carry, D, stencil, BC, dx, cauchy_mult,
                                      p_exp, w1, b1, w2, b2, w3, b3)
        return new, new

    _, traj = lax.scan(step, u0, t[1:] - t[:-1])
    return jnp.concatenate([u0[None], traj], axis=0)


# ----------------------------------- main ------------------------------------
if __name__ == "__main__":
    NX, H, T = 16, 32, 8
    key = jax.random.PRNGKey(0)
    keys = jax.random.split(key, 8)

    # Bayes_Layer parameters + rsample of weights (deterministic via PRNGKey).
    def sample_bayes_layer(k, fin, fout):
        k1, k2, k3, k4, k5, k6 = jax.random.split(k, 6)
        w_mu = 0.1 * jax.random.normal(k1, (fout, fin), jnp.float32)
        w_rho = -3.0 + 0.1 * jax.random.normal(k2, (fout, fin), jnp.float32)
        b_mu = 0.1 * jax.random.normal(k3, (fout,), jnp.float32)
        b_rho = -3.0 + 0.1 * jax.random.normal(k4, (fout,), jnp.float32)
        w = w_mu + jnp.log1p(jnp.exp(w_rho)) * jax.random.normal(k5, (fout, fin))
        b = b_mu + jnp.log1p(jnp.exp(b_rho)) * jax.random.normal(k6, (fout,))
        return w.astype(jnp.float32), b.astype(jnp.float32)

    # layer_sizes = [1, H, H, 1], sigmoid output, bias=True
    w1, b1 = sample_bayes_layer(keys[0], 1, H)
    w2, b2 = sample_bayes_layer(keys[1], H, H)
    w3, b3 = sample_bayes_layer(keys[2], H, 1)

    D = jnp.array([5e-4, 2.5e-4], jnp.float32)
    stencil = jnp.array([-1.0, 1.0], jnp.float32)          # learn_stencil=False
    BC = jnp.array([[1.0, 1.0]], jnp.float32)
    dx = jnp.float32(1.0 / NX)
    cauchy_mult = jnp.float32(1.0 / NX)
    p_exp = jnp.float32(0.0)                                # use_exp=True init

    # 10**p_exp precomputed host-side (hoisted out of the time loop).
    scalars = jnp.array(
        [D[0], D[1], stencil[0], stencil[1], BC[0, 0], BC[0, 1],
         10.0 ** p_exp, dx, cauchy_mult, b3[0]], jnp.float32)
    b1c = b1.reshape(H, 1)
    b2c = b2.reshape(H, 1)
    w3c = w3.reshape(H, 1)   # (1,H) weight as a column for the sublane reduce

    t = jnp.linspace(0.0, 1.0, T).astype(jnp.float32)
    u = jax.random.uniform(keys[3], (T, NX, 2), jnp.float32)  # only u[0] used

    pred = finn_diffsorp_forward(t, u, scalars, w1, b1c, w2, b2c, w3c)
    pred = jax.block_until_ready(pred)

    ref = _ref_forward(t, u, D, stencil, BC, dx, cauchy_mult, p_exp,
                       w1, b1, w2, b2, w3, b3)
    assert pred.shape == (T, NX, 2)
    assert jnp.allclose(pred, ref, rtol=2e-2, atol=1e-4), "mismatch vs reference"

    print("KERNEL_OK")
</pallas_src>

<mosaic_0001>
module attributes {stable_mosaic.version = 11 : i64} {
  func.func @kernel(%arg0: i32, %arg1: memref<10xf32, #tpu.memory_space<smem>>, %arg2: memref<8xf32, #tpu.memory_space<smem>>, %arg3: memref<2x128xf32, #tpu.memory_space<vmem>>, %arg4: memref<32x1xf32, #tpu.memory_space<vmem>>, %arg5: memref<32x1xf32, #tpu.memory_space<vmem>>, %arg6: memref<32x32xf32, #tpu.memory_space<vmem>>, %arg7: memref<32x1xf32, #tpu.memory_space<vmem>>, %arg8: memref<32x1xf32, #tpu.memory_space<vmem>>, %arg9: memref<2x1x128xf32, #tpu.memory_space<vmem>>, %arg10: memref<2x128xf32, #tpu.memory_space<vmem>>) attributes {dimension_semantics = [#tpu.dimension_semantics<arbitrary>], iteration_bounds = array<i64: 1>, scalar_prefetch = 0 : i64, scratch_operands = 1 : i64, tpu.core_type = #tpu.core_type<tc>, window_params = [{transform_indices = @transform_0, window_bounds = array<i64: 10>}, {transform_indices = @transform_1, window_bounds = array<i64: 8>}, {pipeline_mode = #tpu.pipeline_mode<synchronous>, transform_indices = @transform_2, window_bounds = array<i64: 2, 128>}, {pipeline_mode = #tpu.pipeline_mode<synchronous>, transform_indices = @transform_3, window_bounds = array<i64: 32, 1>}, {pipeline_mode = #tpu.pipeline_mode<synchronous>, transform_indices = @transform_4, window_bounds = array<i64: 32, 1>}, {pipeline_mode = #tpu.pipeline_mode<synchronous>, transform_indices = @transform_5, window_bounds = array<i64: 32, 32>}, {pipeline_mode = #tpu.pipeline_mode<synchronous>, transform_indices = @transform_6, window_bounds = array<i64: 32, 1>}, {pipeline_mode = #tpu.pipeline_mode<synchronous>, transform_indices = @transform_7, window_bounds = array<i64: 32, 1>}, {transform_indices = @transform_8, window_bounds = array<i64: 2, 1, 128>}]} {
    %c0_i32 = arith.constant 0 : i32
    %0 = arith.cmpi eq, %arg0, %c0_i32 : i32
    %1 = arith.extui %0 : i1 to i32
    %c0_i32_0 = arith.constant 0 : i32
    %2 = arith.cmpi ne, %1, %c0_i32_0 : i32
    scf.if %2 {
      %c0_80 = arith.constant 0 : index
      %c0_81 = arith.constant 0 : index
      %517 = vector.load %arg3[%c0_80, %c0_81] : memref<2x128xf32, #tpu.memory_space<vmem>>, vector<2x128xf32>
      %c0_82 = arith.constant 0 : index
      %c0_83 = arith.constant 0 : index
      %518 = vector.load %arg10[%c0_82, %c0_83] : memref<2x128xf32, #tpu.memory_space<vmem>>, vector<2x128xf32>
      tpu.vector_store %arg10[%c0_82, %c0_83], %517 {strides = array<i32>} : memref<2x128xf32, #tpu.memory_space<vmem>>, vector<2x128xf32>,
    } else {
    }
    %c0 = arith.constant 0 : index
    %3 = memref.load %arg1[%c0] : memref<10xf32, #tpu.memory_space<smem>>
    %c1 = arith.constant 1 : index
    %4 = memref.load %arg1[%c1] : memref<10xf32, #tpu.memory_space<smem>>
    %c2 = arith.constant 2 : index
    %5 = memref.load %arg1[%c2] : memref<10xf32, #tpu.memory_space<smem>>
    %c3 = arith.constant 3 : index
    %6 = memref.load %arg1[%c3] : memref<10xf32, #tpu.memory_space<smem>>
    %c4 = arith.constant 4 : index
    %7 = memref.load %arg1[%c4] : memref<10xf32, #tpu.memory_space<smem>>
    %c5 = arith.constant 5 : index
    %8 = memref.load %arg1[%c5] : memref<10xf32, #tpu.memory_space<smem>>
    %c6 = arith.constant 6 : index
    %9 = memref.load %arg1[%c6] : memref<10xf32, #tpu.memory_space<smem>>
    %c7 = arith.constant 7 : index
    %10 = memref.load %arg1[%c7] : memref<10xf32, #tpu.memory_space<smem>>
    %c8 = arith.constant 8 : index
    %11 = memref.load %arg1[%c8] : memref<10xf32, #tpu.memory_space<smem>>
    %c9 = arith.constant 9 : index
    %12 = memref.load %arg1[%c9] : memref<10xf32, #tpu.memory_space<smem>>
    %13 = tpu.iota {dimensions = array<i32: 1>} : vector<1x128xi32>
    %c0_i32_1 = arith.constant 0 : i32
    %14 = vector.broadcast %c0_i32_1 : i32 to vector<1x128xi32>
    %15 = arith.cmpi eq, %13, %14 : vector<1x128xi32>
    %c15_i32 = arith.constant 15 : i32
    %16 = vector.broadcast %c15_i32 : i32 to vector<1x128xi32>
    %17 = arith.cmpi eq, %13, %16 : vector<1x128xi32>
    %18 = arith.mulf %3, %10 : f32
    %19 = arith.mulf %18, %11 : f32
    %cst = arith.constant 2.000000e+00 : f32
    %20 = arith.mulf %cst, %5 : f32
    %c0_2 = arith.constant 0 : index
    %c0_3 = arith.constant 0 : index
    %21 = vector.load %arg4[%c0_2, %c0_3] : memref<32x1xf32, #tpu.memory_space<vmem>>, vector<32x1xf32>
    %c0_4 = arith.constant 0 : index
    %c0_5 = arith.constant 0 : index
    %22 = vector.load %arg5[%c0_4, %c0_5] : memref<32x1xf32, #tpu.memory_space<vmem>>, vector<32x1xf32>
    %c0_6 = arith.constant 0 : index
    %c0_7 = arith.constant 0 : index
    %23 = vector.load %arg6[%c0_6, %c0_7] : memref<32x32xf32, #tpu.memory_space<vmem>>, vector<32x32xf32>
    %24 = arith.truncf %23 : vector<32x32xf32> to vector<32x32xbf16>
    %c0_8 = arith.constant 0 : index
    %c0_9 = arith.constant 0 : index
    %25 = vector.load %arg7[%c0_8, %c0_9] : memref<32x1xf32, #tpu.memory_space<vmem>>, vector<32x1xf32>
    %c0_10 = arith.constant 0 : index
    %c0_11 = arith.constant 0 : index
    %26 = vector.load %arg8[%c0_10, %c0_11] : memref<32x1xf32, #tpu.memory_space<vmem>>, vector<32x1xf32>
    %c0_12 = arith.constant 0 : index
    %c0_13 = arith.constant 0 : index
    %27 = vector.load %arg10[%c0_12, %c0_13] : memref<2x128xf32, #tpu.memory_space<vmem>>, vector<2x128xf32>
    %28 = vector.extract_strided_slice %27 {offsets = [0, 0], sizes = [1, 128], strides = [1, 1]} : vector<2x128xf32> to vector<1x128xf32>
    %29 = vector.broadcast %21 : vector<32x1xf32> to vector<32x128xf32>
    %30 = vector.broadcast %28 : vector<1x128xf32> to vector<32x128xf32>
    %31 = arith.mulf %29, %30 : vector<32x128xf32>
    %32 = vector.broadcast %22 : vector<32x1xf32> to vector<32x128xf32>
    %33 = arith.addf %31, %32 : vector<32x128xf32>
    %34 = math.tanh %33 : vector<32x128xf32>
    %35 = arith.truncf %34 : vector<32x128xf32> to vector<32x128xbf16>
    %cst_14 = arith.constant dense<0.000000e+00> : vector<32x128xf32>
    %36 = tpu.matmul %24, %35, %cst_14 {dimension_numbers = #tpu.dot_dimension_numbers<[1], [0], [0], [1], [0, 0, 1, 1], [], []>} : vector<32x32xbf16>, vector<32x128xbf16>, vector<32x128xf32> -> vector<32x128xf32>
    %37 = vector.broadcast %25 : vector<32x1xf32> to vector<32x128xf32>
    %38 = arith.addf %36, %37 : vector<32x128xf32>
    %39 = math.tanh %38 : vector<32x128xf32>
    %40 = vector.broadcast %26 : vector<32x1xf32> to vector<32x128xf32>
    %41 = arith.mulf %40, %39 : vector<32x128xf32>
    %cst_15 = arith.constant dense<0.000000e+00> : vector<128xf32>
    %42 = vector.multi_reduction <add>, %41, %cst_15 [0] : vector<32x128xf32> to vector<128xf32>
    %43 = vector.shape_cast %42 : vector<128xf32> to vector<1x128xf32>
    %44 = vector.broadcast %12 : f32 to vector<1x128xf32>
    %45 = arith.addf %43, %44 : vector<1x128xf32>
    %46 = arith.negf %45 : vector<1x128xf32>
    %47 = math.exp %46 : vector<1x128xf32>
    %cst_16 = arith.constant 1.000000e+00 : f32
    %48 = vector.broadcast %cst_16 : f32 to vector<1x128xf32>
    %49 = arith.addf %48, %47 : vector<1x128xf32>
    %50 = arith.divf %48, %49 : vector<1x128xf32>
    %51 = vector.broadcast %9 : f32 to vector<1x128xf32>
    %52 = arith.mulf %50, %51 : vector<1x128xf32>
    %c1_i32 = arith.constant 1 : i32
    %53 = tpu.dynamic_rotate %28 by %c1_i32 dim 1 : vector<1x128xf32>, i32 -> vector<1x128xf32>
    %c127_i32 = arith.constant 127 : i32
    %54 = tpu.dynamic_rotate %28 by %c127_i32 dim 1 : vector<1x128xf32>, i32 -> vector<1x128xf32>
    %55 = arith.subf %53, %28 : vector<1x128xf32>
    %56 = vector.broadcast %19 : f32 to vector<1x128xf32>
    %57 = arith.mulf %56, %55 : vector<1x128xf32>
    %58 = vector.broadcast %7 : f32 to vector<1x128xf32>
    %59 = arith.select %15, %58, %53 : vector<1x128xi1>, vector<1x128xf32>
    %60 = vector.broadcast %8 : f32 to vector<1x128xf32>
    %61 = arith.select %15, %60, %53 : vector<1x128xi1>, vector<1x128xf32>
    %62 = arith.select %17, %57, %54 : vector<1x128xi1>, vector<1x128xf32>
    %63 = vector.broadcast %20 : f32 to vector<1x128xf32>
    %64 = arith.mulf %63, %28 : vector<1x128xf32>
    %65 = vector.broadcast %3 : f32 to vector<1x128xf32>
    %66 = arith.mulf %65, %52 : vector<1x128xf32>
    %67 = arith.addf %59, %62 : vector<1x128xf32>
    %68 = vector.broadcast %6 : f32 to vector<1x128xf32>
    %69 = arith.mulf %68, %67 : vector<1x128xf32>
    %70 = arith.addf %64, %69 : vector<1x128xf32>
    %71 = arith.mulf %66, %70 : vector<1x128xf32>
    %72 = arith.addf %61, %62 : vector<1x128xf32>
    %73 = vector.broadcast %6 : f32 to vector<1x128xf32>
    %74 = arith.mulf %73, %72 : vector<1x128xf32>
    %75 = arith.addf %64, %74 : vector<1x128xf32>
    %76 = vector.broadcast %4 : f32 to vector<1x128xf32>
    %77 = arith.mulf %76, %75 : vector<1x128xf32>
    %78 = tpu.concatenate %71, %77 in 0 : vector<1x128xf32>, vector<1x128xf32> -> vector<2x128xf32>
    %c8_i32 = arith.constant 8 : i32
    %79 = arith.muli %arg0, %c8_i32 : i32
    %c0_i32_17 = arith.constant 0 : i32
    %80 = arith.addi %79, %c0_i32_17 : i32
    %81 = arith.index_cast %80 : i32 to index
    %82 = memref.load %arg2[%81] : memref<8xf32, #tpu.memory_space<smem>>
    %83 = vector.broadcast %82 : f32 to vector<2x128xf32>
    %84 = arith.mulf %83, %78 : vector<2x128xf32>
    %85 = arith.addf %27, %84 : vector<2x128xf32>
    %86 = vector.extract_strided_slice %85 {offsets = [0, 0], sizes = [2, 16], strides = [1, 1]} : vector<2x128xf32> to vector<2x16xf32>
    %87 = vector.shape_cast %86 : vector<2x16xf32> to vector<2x1x16xf32>
    %c0_18 = arith.constant 0 : index
    %c0_19 = arith.constant 0 : index
    %c0_20 = arith.constant 0 : index
    %88 = vector.load %arg9[%c0_18, %c0_19, %c0_20] : memref<2x1x128xf32, #tpu.memory_space<vmem>>, vector<2x1x16xf32>
    tpu.vector_store %arg9[%c0_18, %c0_19, %c0_20], %87 {strides = array<i32>} : memref<2x1x128xf32, #tpu.memory_space<vmem>>, vector<2x1x16xf32>,
    %89 = vector.extract_strided_slice %85 {offsets = [0, 0], sizes = [1, 128], strides = [1, 1]} : vector<2x128xf32> to vector<1x128xf32>
    %90 = vector.broadcast %21 : vector<32x1xf32> to vector<32x128xf32>
    %91 = vector.broadcast %89 : vector<1x128xf32> to vector<32x128xf32>
    %92 = arith.mulf %90, %91 : vector<32x128xf32>
    %93 = vector.broadcast %22 : vector<32x1xf32> to vector<32x128xf32>
    %94 = arith.addf %92, %93 : vector<32x128xf32>
    %95 = math.tanh %94 : vector<32x128xf32>
    %96 = arith.truncf %95 : vector<32x128xf32> to vector<32x128xbf16>
    %cst_21 = arith.constant dense<0.000000e+00> : vector<32x128xf32>
    %97 = tpu.matmul %24, %96, %cst_21 {dimension_numbers = #tpu.dot_dimension_numbers<[1], [0], [0], [1], [0, 0, 1, 1], [], []>} : vector<32x32xbf16>, vector<32x128xbf16>, vector<32x128xf32> -> vector<32x128xf32>
    %98 = vector.broadcast %25 : vector<32x1xf32> to vector<32x128xf32>
    %99 = arith.addf %97, %98 : vector<32x128xf32>
    %100 = math.tanh %99 : vector<32x128xf32>
    %101 = vector.broadcast %26 : vector<32x1xf32> to vector<32x128xf32>
    %102 = arith.mulf %101, %100 : vector<32x128xf32>
    %cst_22 = arith.constant dense<0.000000e+00> : vector<128xf32>
    %103 = vector.multi_reduction <add>, %102, %cst_22 [0] : vector<32x128xf32> to vector<128xf32>
    %104 = vector.shape_cast %103 : vector<128xf32> to vector<1x128xf32>
    %105 = vector.broadcast %12 : f32 to vector<1x128xf32>
    %106 = arith.addf %104, %105 : vector<1x128xf32>
    %107 = arith.negf %106 : vector<1x128xf32>
    %108 = math.exp %107 : vector<1x128xf32>
    %cst_23 = arith.constant 1.000000e+00 : f32
    %109 = vector.broadcast %cst_23 : f32 to vector<1x128xf32>
    %110 = arith.addf %109, %108 : vector<1x128xf32>
    %111 = arith.divf %109, %110 : vector<1x128xf32>
    %112 = vector.broadcast %9 : f32 to vector<1x128xf32>
    %113 = arith.mulf %111, %112 : vector<1x128xf32>
    %c1_i32_24 = arith.constant 1 : i32
    %114 = tpu.dynamic_rotate %89 by %c1_i32_24 dim 1 : vector<1x128xf32>, i32 -> vector<1x128xf32>
    %c127_i32_25 = arith.constant 127 : i32
    %115 = tpu.dynamic_rotate %89 by %c127_i32_25 dim 1 : vector<1x128xf32>, i32 -> vector<1x128xf32>
    %116 = arith.subf %114, %89 : vector<1x128xf32>
    %117 = vector.broadcast %19 : f32 to vector<1x128xf32>
    %118 = arith.mulf %117, %116 : vector<1x128xf32>
    %119 = vector.broadcast %7 : f32 to vector<1x128xf32>
    %120 = arith.select %15, %119, %114 : vector<1x128xi1>, vector<1x128xf32>
    %121 = vector.broadcast %8 : f32 to vector<1x128xf32>
    %122 = arith.select %15, %121, %114 : vector<1x128xi1>, vector<1x128xf32>
    %123 = arith.select %17, %118, %115 : vector<1x128xi1>, vector<1x128xf32>
    %124 = vector.broadcast %20 : f32 to vector<1x128xf32>
    %125 = arith.mulf %124, %89 : vector<1x128xf32>
    %126 = vector.broadcast %3 : f32 to vector<1x128xf32>
    %127 = arith.mulf %126, %113 : vector<1x128xf32>
    %128 = arith.addf %120, %123 : vector<1x128xf32>
    %129 = vector.broadcast %6 : f32 to vector<1x128xf32>
    %130 = arith.mulf %129, %128 : vector<1x128xf32>
    %131 = arith.addf %125, %130 : vector<1x128xf32>
    %132 = arith.mulf %127, %131 : vector<1x128xf32>
    %133 = arith.addf %122, %123 : vector<1x128xf32>
    %134 = vector.broadcast %6 : f32 to vector<1x128xf32>
    %135 = arith.mulf %134, %133 : vector<1x128xf32>
    %136 = arith.addf %125, %135 : vector<1x128xf32>
    %137 = vector.broadcast %4 : f32 to vector<1x128xf32>
    %138 = arith.mulf %137, %136 : vector<1x128xf32>
    %139 = tpu.concatenate %132, %138 in 0 : vector<1x128xf32>, vector<1x128xf32> -> vector<2x128xf32>
    %c8_i32_26 = arith.constant 8 : i32
    %140 = arith.muli %arg0, %c8_i32_26 : i32
    %c1_i32_27 = arith.constant 1 : i32
    %141 = arith.addi %140, %c1_i32_27 : i32
    %142 = arith.index_cast %141 : i32 to index
    %143 = memref.load %arg2[%142] : memref<8xf32, #tpu.memory_space<smem>>
    %144 = vector.broadcast %143 : f32 to vector<2x128xf32>
    %145 = arith.mulf %144, %139 : vector<2x128xf32>
    %146 = arith.addf %85, %145 : vector<2x128xf32>
    %147 = vector.extract_strided_slice %146 {offsets = [0, 0], sizes = [2, 16], strides = [1, 1]} : vector<2x128xf32> to vector<2x16xf32>
    %148 = vector.shape_cast %147 : vector<2x16xf32> to vector<2x1x16xf32>
    %c0_28 = arith.constant 0 : index
    %c0_29 = arith.constant 0 : index
    %c16 = arith.constant 16 : index
    %149 = vector.load %arg9[%c0_28, %c0_29, %c16] : memref<2x1x128xf32, #tpu.memory_space<vmem>>, vector<2x1x16xf32>
    tpu.vector_store %arg9[%c0_28, %c0_29, %c16], %148 {strides = array<i32>} : memref<2x1x128xf32, #tpu.memory_space<vmem>>, vector<2x1x16xf32>,
    %150 = vector.extract_strided_slice %146 {offsets = [0, 0], sizes = [1, 128], strides = [1, 1]} : vector<2x128xf32> to vector<1x128xf32>
    %151 = vector.broadcast %21 : vector<32x1xf32> to vector<32x128xf32>
    %152 = vector.broadcast %150 : vector<1x128xf32> to vector<32x128xf32>
    %153 = arith.mulf %151, %152 : vector<32x128xf32>
    %154 = vector.broadcast %22 : vector<32x1xf32> to vector<32x128xf32>
    %155 = arith.addf %153, %154 : vector<32x128xf32>
    %156 = math.tanh %155 : vector<32x128xf32>
    %157 = arith.truncf %156 : vector<32x128xf32> to vector<32x128xbf16>
    %cst_30 = arith.constant dense<0.000000e+00> : vector<32x128xf32>
    %158 = tpu.matmul %24, %157, %cst_30 {dimension_numbers = #tpu.dot_dimension_numbers<[1], [0], [0], [1], [0, 0, 1, 1], [], []>} : vector<32x32xbf16>, vector<32x128xbf16>, vector<32x128xf32> -> vector<32x128xf32>
    %159 = vector.broadcast %25 : vector<32x1xf32> to vector<32x128xf32>
    %160 = arith.addf %158, %159 : vector<32x128xf32>
    %161 = math.tanh %160 : vector<32x128xf32>
    %162 = vector.broadcast %26 : vector<32x1xf32> to vector<32x128xf32>
    %163 = arith.mulf %162, %161 : vector<32x128xf32>
    %cst_31 = arith.constant dense<0.000000e+00> : vector<128xf32>
    %164 = vector.multi_reduction <add>, %163, %cst_31 [0] : vector<32x128xf32> to vector<128xf32>
    %165 = vector.shape_cast %164 : vector<128xf32> to vector<1x128xf32>
    %166 = vector.broadcast %12 : f32 to vector<1x128xf32>
    %167 = arith.addf %165, %166 : vector<1x128xf32>
    %168 = arith.negf %167 : vector<1x128xf32>
    %169 = math.exp %168 : vector<1x128xf32>
    %cst_32 = arith.constant 1.000000e+00 : f32
    %170 = vector.broadcast %cst_32 : f32 to vector<1x128xf32>
    %171 = arith.addf %170, %169 : vector<1x128xf32>
    %172 = arith.divf %170, %171 : vector<1x128xf32>
    %173 = vector.broadcast %9 : f32 to vector<1x128xf32>
    %174 = arith.mulf %172, %173 : vector<1x128xf32>
    %c1_i32_33 = arith.constant 1 : i32
    %175 = tpu.dynamic_rotate %150 by %c1_i32_33 dim 1 : vector<1x128xf32>, i32 -> vector<1x128xf32>
    %c127_i32_34 = arith.constant 127 : i32
    %176 = tpu.dynamic_rotate %150 by %c127_i32_34 dim 1 : vector<1x128xf32>, i32 -> vector<1x128xf32>
    %177 = arith.subf %175, %150 : vector<1x128xf32>
    %178 = vector.broadcast %19 : f32 to vector<1x128xf32>
    %179 = arith.mulf %178, %177 : vector<1x128xf32>
    %180 = vector.broadcast %7 : f32 to vector<1x128xf32>
    %181 = arith.select %15, %180, %175 : vector<1x128xi1>, vector<1x128xf32>
    %182 = vector.broadcast %8 : f32 to vector<1x128xf32>
    %183 = arith.select %15, %182, %175 : vector<1x128xi1>, vector<1x128xf32>
    %184 = arith.select %17, %179, %176 : vector<1x128xi1>, vector<1x128xf32>
    %185 = vector.broadcast %20 : f32 to vector<1x128xf32>
    %186 = arith.mulf %185, %150 : vector<1x128xf32>
    %187 = vector.broadcast %3 : f32 to vector<1x128xf32>
    %188 = arith.mulf %187, %174 : vector<1x128xf32>
    %189 = arith.addf %181, %184 : vector<1x128xf32>
    %190 = vector.broadcast %6 : f32 to vector<1x128xf32>
    %191 = arith.mulf %190, %189 : vector<1x128xf32>
    %192 = arith.addf %186, %191 : vector<1x128xf32>
    %193 = arith.mulf %188, %192 : vector<1x128xf32>
    %194 = arith.addf %183, %184 : vector<1x128xf32>
    %195 = vector.broadcast %6 : f32 to vector<1x128xf32>
    %196 = arith.mulf %195, %194 : vector<1x128xf32>
    %197 = arith.addf %186, %196 : vector<1x128xf32>
    %198 = vector.broadcast %4 : f32 to vector<1x128xf32>
    %199 = arith.mulf %198, %197 : vector<1x128xf32>
    %200 = tpu.concatenate %193, %199 in 0 : vector<1x128xf32>, vector<1x128xf32> -> vector<2x128xf32>
    %c8_i32_35 = arith.constant 8 : i32
    %201 = arith.muli %arg0, %c8_i32_35 : i32
    %c2_i32 = arith.constant 2 : i32
    %202 = arith.addi %201, %c2_i32 : i32
    %203 = arith.index_cast %202 : i32 to index
    %204 = memref.load %arg2[%203] : memref<8xf32, #tpu.memory_space<smem>>
    %205 = vector.broadcast %204 : f32 to vector<2x128xf32>
    %206 = arith.mulf %205, %200 : vector<2x128xf32>
    %207 = arith.addf %146, %206 : vector<2x128xf32>
    %208 = vector.extract_strided_slice %207 {offsets = [0, 0], sizes = [2, 16], strides = [1, 1]} : vector<2x128xf32> to vector<2x16xf32>
    %209 = vector.shape_cast %208 : vector<2x16xf32> to vector<2x1x16xf32>
    %c0_36 = arith.constant 0 : index
    %c0_37 = arith.constant 0 : index
    %c32 = arith.constant 32 : index
    %210 = vector.load %arg9[%c0_36, %c0_37, %c32] : memref<2x1x128xf32, #tpu.memory_space<vmem>>, vector<2x1x16xf32>
    tpu.vector_store %arg9[%c0_36, %c0_37, %c32], %209 {strides = array<i32>} : memref<2x1x128xf32, #tpu.memory_space<vmem>>, vector<2x1x16xf32>,
    %211 = vector.extract_strided_slice %207 {offsets = [0, 0], sizes = [1, 128], strides = [1, 1]} : vector<2x128xf32> to vector<1x128xf32>
    %212 = vector.broadcast %21 : vector<32x1xf32> to vector<32x128xf32>
    %213 = vector.broadcast %211 : vector<1x128xf32> to vector<32x128xf32>
    %214 = arith.mulf %212, %213 : vector<32x128xf32>
    %215 = vector.broadcast %22 : vector<32x1xf32> to vector<32x128xf32>
    %216 = arith.addf %214, %215 : vector<32x128xf32>
    %217 = math.tanh %216 : vector<32x128xf32>
    %218 = arith.truncf %217 : vector<32x128xf32> to vector<32x128xbf16>
    %cst_38 = arith.constant dense<0.000000e+00> : vector<32x128xf32>
    %219 = tpu.matmul %24, %218, %cst_38 {dimension_numbers = #tpu.dot_dimension_numbers<[1], [0], [0], [1], [0, 0, 1, 1], [], []>} : vector<32x32xbf16>, vector<32x128xbf16>, vector<32x128xf32> -> vector<32x128xf32>
    %220 = vector.broadcast %25 : vector<32x1xf32> to vector<32x128xf32>
    %221 = arith.addf %219, %220 : vector<32x128xf32>
    %222 = math.tanh %221 : vector<32x128xf32>
    %223 = vector.broadcast %26 : vector<32x1xf32> to vector<32x128xf32>
    %224 = arith.mulf %223, %222 : vector<32x128xf32>
    %cst_39 = arith.constant dense<0.000000e+00> : vector<128xf32>
    %225 = vector.multi_reduction <add>, %224, %cst_39 [0] : vector<32x128xf32> to vector<128xf32>
    %226 = vector.shape_cast %225 : vector<128xf32> to vector<1x128xf32>
    %227 = vector.broadcast %12 : f32 to vector<1x128xf32>
    %228 = arith.addf %226, %227 : vector<1x128xf32>
    %229 = arith.negf %228 : vector<1x128xf32>
    %230 = math.exp %229 : vector<1x128xf32>
    %cst_40 = arith.constant 1.000000e+00 : f32
    %231 = vector.broadcast %cst_40 : f32 to vector<1x128xf32>
    %232 = arith.addf %231, %230 : vector<1x128xf32>
    %233 = arith.divf %231, %232 : vector<1x128xf32>
    %234 = vector.broadcast %9 : f32 to vector<1x128xf32>
    %235 = arith.mulf %233, %234 : vector<1x128xf32>
    %c1_i32_41 = arith.constant 1 : i32
    %236 = tpu.dynamic_rotate %211 by %c1_i32_41 dim 1 : vector<1x128xf32>, i32 -> vector<1x128xf32>
    %c127_i32_42 = arith.constant 127 : i32
    %237 = tpu.dynamic_rotate %211 by %c127_i32_42 dim 1 : vector<1x128xf32>, i32 -> vector<1x128xf32>
    %238 = arith.subf %236, %211 : vector<1x128xf32>
    %239 = vector.broadcast %19 : f32 to vector<1x128xf32>
    %240 = arith.mulf %239, %238 : vector<1x128xf32>
    %241 = vector.broadcast %7 : f32 to vector<1x128xf32>
    %242 = arith.select %15, %241, %236 : vector<1x128xi1>, vector<1x128xf32>
    %243 = vector.broadcast %8 : f32 to vector<1x128xf32>
    %244 = arith.select %15, %243, %236 : vector<1x128xi1>, vector<1x128xf32>
    %245 = arith.select %17, %240, %237 : vector<1x128xi1>, vector<1x128xf32>
    %246 = vector.broadcast %20 : f32 to vector<1x128xf32>
    %247 = arith.mulf %246, %211 : vector<1x128xf32>
    %248 = vector.broadcast %3 : f32 to vector<1x128xf32>
    %249 = arith.mulf %248, %235 : vector<1x128xf32>
    %250 = arith.addf %242, %245 : vector<1x128xf32>
    %251 = vector.broadcast %6 : f32 to vector<1x128xf32>
    %252 = arith.mulf %251, %250 : vector<1x128xf32>
    %253 = arith.addf %247, %252 : vector<1x128xf32>
    %254 = arith.mulf %249, %253 : vector<1x128xf32>
    %255 = arith.addf %244, %245 : vector<1x128xf32>
    %256 = vector.broadcast %6 : f32 to vector<1x128xf32>
    %257 = arith.mulf %256, %255 : vector<1x128xf32>
    %258 = arith.addf %247, %257 : vector<1x128xf32>
    %259 = vector.broadcast %4 : f32 to vector<1x128xf32>
    %260 = arith.mulf %259, %258 : vector<1x128xf32>
    %261 = tpu.concatenate %254, %260 in 0 : vector<1x128xf32>, vector<1x128xf32> -> vector<2x128xf32>
    %c8_i32_43 = arith.constant 8 : i32
    %262 = arith.muli %arg0, %c8_i32_43 : i32
    %c3_i32 = arith.constant 3 : i32
    %263 = arith.addi %262, %c3_i32 : i32
    %264 = arith.index_cast %263 : i32 to index
    %265 = memref.load %arg2[%264] : memref<8xf32, #tpu.memory_space<smem>>
    %266 = vector.broadcast %265 : f32 to vector<2x128xf32>
    %267 = arith.mulf %266, %261 : vector<2x128xf32>
    %268 = arith.addf %207, %267 : vector<2x128xf32>
    %269 = vector.extract_strided_slice %268 {offsets = [0, 0], sizes = [2, 16], strides = [1, 1]} : vector<2x128xf32> to vector<2x16xf32>
    %270 = vector.shape_cast %269 : vector<2x16xf32> to vector<2x1x16xf32>
    %c0_44 = arith.constant 0 : index
    %c0_45 = arith.constant 0 : index
    %c48 = arith.constant 48 : index
    %271 = vector.load %arg9[%c0_44, %c0_45, %c48] : memref<2x1x128xf32, #tpu.memory_space<vmem>>, vector<2x1x16xf32>
    tpu.vector_store %arg9[%c0_44, %c0_45, %c48], %270 {strides = array<i32>} : memref<2x1x128xf32, #tpu.memory_space<vmem>>, vector<2x1x16xf32>,
    %272 = vector.extract_strided_slice %268 {offsets = [0, 0], sizes = [1, 128], strides = [1, 1]} : vector<2x128xf32> to vector<1x128xf32>
    %273 = vector.broadcast %21 : vector<32x1xf32> to vector<32x128xf32>
    %274 = vector.broadcast %272 : vector<1x128xf32> to vector<32x128xf32>
    %275 = arith.mulf %273, %274 : vector<32x128xf32>
    %276 = vector.broadcast %22 : vector<32x1xf32> to vector<32x128xf32>
    %277 = arith.addf %275, %276 : vector<32x128xf32>
    %278 = math.tanh %277 : vector<32x128xf32>
    %279 = arith.truncf %278 : vector<32x128xf32> to vector<32x128xbf16>
    %cst_46 = arith.constant dense<0.000000e+00> : vector<32x128xf32>
    %280 = tpu.matmul %24, %279, %cst_46 {dimension_numbers = #tpu.dot_dimension_numbers<[1], [0], [0], [1], [0, 0, 1, 1], [], []>} : vector<32x32xbf16>, vector<32x128xbf16>, vector<32x128xf32> -> vector<32x128xf32>
    %281 = vector.broadcast %25 : vector<32x1xf32> to vector<32x128xf32>
    %282 = arith.addf %280, %281 : vector<32x128xf32>
    %283 = math.tanh %282 : vector<32x128xf32>
    %284 = vector.broadcast %26 : vector<32x1xf32> to vector<32x128xf32>
    %285 = arith.mulf %284, %283 : vector<32x128xf32>
    %cst_47 = arith.constant dense<0.000000e+00> : vector<128xf32>
    %286 = vector.multi_reduction <add>, %285, %cst_47 [0] : vector<32x128xf32> to vector<128xf32>
    %287 = vector.shape_cast %286 : vector<128xf32> to vector<1x128xf32>
    %288 = vector.broadcast %12 : f32 to vector<1x128xf32>
    %289 = arith.addf %287, %288 : vector<1x128xf32>
    %290 = arith.negf %289 : vector<1x128xf32>
    %291 = math.exp %290 : vector<1x128xf32>
    %cst_48 = arith.constant 1.000000e+00 : f32
    %292 = vector.broadcast %cst_48 : f32 to vector<1x128xf32>
    %293 = arith.addf %292, %291 : vector<1x128xf32>
    %294 = arith.divf %292, %293 : vector<1x128xf32>
    %295 = vector.broadcast %9 : f32 to vector<1x128xf32>
    %296 = arith.mulf %294, %295 : vector<1x128xf32>
    %c1_i32_49 = arith.constant 1 : i32
    %297 = tpu.dynamic_rotate %272 by %c1_i32_49 dim 1 : vector<1x128xf32>, i32 -> vector<1x128xf32>
    %c127_i32_50 = arith.constant 127 : i32
    %298 = tpu.dynamic_rotate %272 by %c127_i32_50 dim 1 : vector<1x128xf32>, i32 -> vector<1x128xf32>
    %299 = arith.subf %297, %272 : vector<1x128xf32>
    %300 = vector.broadcast %19 : f32 to vector<1x128xf32>
    %301 = arith.mulf %300, %299 : vector<1x128xf32>
    %302 = vector.broadcast %7 : f32 to vector<1x128xf32>
    %303 = arith.select %15, %302, %297 : vector<1x128xi1>, vector<1x128xf32>
    %304 = vector.broadcast %8 : f32 to vector<1x128xf32>
    %305 = arith.select %15, %304, %297 : vector<1x128xi1>, vector<1x128xf32>
    %306 = arith.select %17, %301, %298 : vector<1x128xi1>, vector<1x128xf32>
    %307 = vector.broadcast %20 : f32 to vector<1x128xf32>
    %308 = arith.mulf %307, %272 : vector<1x128xf32>
    %309 = vector.broadcast %3 : f32 to vector<1x128xf32>
    %310 = arith.mulf %309, %296 : vector<1x128xf32>
    %311 = arith.addf %303, %306 : vector<1x128xf32>
    %312 = vector.broadcast %6 : f32 to vector<1x128xf32>
    %313 = arith.mulf %312, %311 : vector<1x128xf32>
    %314 = arith.addf %308, %313 : vector<1x128xf32>
    %315 = arith.mulf %310, %314 : vector<1x128xf32>
    %316 = arith.addf %305, %306 : vector<1x128xf32>
    %317 = vector.broadcast %6 : f32 to vector<1x128xf32>
    %318 = arith.mulf %317, %316 : vector<1x128xf32>
    %319 = arith.addf %308, %318 : vector<1x128xf32>
    %320 = vector.broadcast %4 : f32 to vector<1x128xf32>
    %321 = arith.mulf %320, %319 : vector<1x128xf32>
    %322 = tpu.concatenate %315, %321 in 0 : vector<1x128xf32>, vector<1x128xf32> -> vector<2x128xf32>
    %c8_i32_51 = arith.constant 8 : i32
    %323 = arith.muli %arg0, %c8_i32_51 : i32
    %c4_i32 = arith.constant 4 : i32
    %324 = arith.addi %323, %c4_i32 : i32
    %325 = arith.index_cast %324 : i32 to index
    %326 = memref.load %arg2[%325] : memref<8xf32, #tpu.memory_space<smem>>
    %327 = vector.broadcast %326 : f32 to vector<2x128xf32>
    %328 = arith.mulf %327, %322 : vector<2x128xf32>
    %329 = arith.addf %268, %328 : vector<2x128xf32>
    %330 = vector.extract_strided_slice %329 {offsets = [0, 0], sizes = [2, 16], strides = [1, 1]} : vector<2x128xf32> to vector<2x16xf32>
    %331 = vector.shape_cast %330 : vector<2x16xf32> to vector<2x1x16xf32>
    %c0_52 = arith.constant 0 : index
    %c0_53 = arith.constant 0 : index
    %c64 = arith.constant 64 : index
    %332 = vector.load %arg9[%c0_52, %c0_53, %c64] : memref<2x1x128xf32, #tpu.memory_space<vmem>>, vector<2x1x16xf32>
    tpu.vector_store %arg9[%c0_52, %c0_53, %c64], %331 {strides = array<i32>} : memref<2x1x128xf32, #tpu.memory_space<vmem>>, vector<2x1x16xf32>,
    %333 = vector.extract_strided_slice %329 {offsets = [0, 0], sizes = [1, 128], strides = [1, 1]} : vector<2x128xf32> to vector<1x128xf32>
    %334 = vector.broadcast %21 : vector<32x1xf32> to vector<32x128xf32>
    %335 = vector.broadcast %333 : vector<1x128xf32> to vector<32x128xf32>
    %336 = arith.mulf %334, %335 : vector<32x128xf32>
    %337 = vector.broadcast %22 : vector<32x1xf32> to vector<32x128xf32>
    %338 = arith.addf %336, %337 : vector<32x128xf32>
    %339 = math.tanh %338 : vector<32x128xf32>
    %340 = arith.truncf %339 : vector<32x128xf32> to vector<32x128xbf16>
    %cst_54 = arith.constant dense<0.000000e+00> : vector<32x128xf32>
    %341 = tpu.matmul %24, %340, %cst_54 {dimension_numbers = #tpu.dot_dimension_numbers<[1], [0], [0], [1], [0, 0, 1, 1], [], []>} : vector<32x32xbf16>, vector<32x128xbf16>, vector<32x128xf32> -> vector<32x128xf32>
    %342 = vector.broadcast %25 : vector<32x1xf32> to vector<32x128xf32>
    %343 = arith.addf %341, %342 : vector<32x128xf32>
    %344 = math.tanh %343 : vector<32x128xf32>
    %345 = vector.broadcast %26 : vector<32x1xf32> to vector<32x128xf32>
    %346 = arith.mulf %345, %344 : vector<32x128xf32>
    %cst_55 = arith.constant dense<0.000000e+00> : vector<128xf32>
    %347 = vector.multi_reduction <add>, %346, %cst_55 [0] : vector<32x128xf32> to vector<128xf32>
    %348 = vector.shape_cast %347 : vector<128xf32> to vector<1x128xf32>
    %349 = vector.broadcast %12 : f32 to vector<1x128xf32>
    %350 = arith.addf %348, %349 : vector<1x128xf32>
    %351 = arith.negf %350 : vector<1x128xf32>
    %352 = math.exp %351 : vector<1x128xf32>
    %cst_56 = arith.constant 1.000000e+00 : f32
    %353 = vector.broadcast %cst_56 : f32 to vector<1x128xf32>
    %354 = arith.addf %353, %352 : vector<1x128xf32>
    %355 = arith.divf %353, %354 : vector<1x128xf32>
    %356 = vector.broadcast %9 : f32 to vector<1x128xf32>
    %357 = arith.mulf %355, %356 : vector<1x128xf32>
    %c1_i32_57 = arith.constant 1 : i32
    %358 = tpu.dynamic_rotate %333 by %c1_i32_57 dim 1 : vector<1x128xf32>, i32 -> vector<1x128xf32>
    %c127_i32_58 = arith.constant 127 : i32
    %359 = tpu.dynamic_rotate %333 by %c127_i32_58 dim 1 : vector<1x128xf32>, i32 -> vector<1x128xf32>
    %360 = arith.subf %358, %333 : vector<1x128xf32>
    %361 = vector.broadcast %19 : f32 to vector<1x128xf32>
    %362 = arith.mulf %361, %360 : vector<1x128xf32>
    %363 = vector.broadcast %7 : f32 to vector<1x128xf32>
    %364 = arith.select %15, %363, %358 : vector<1x128xi1>, vector<1x128xf32>
    %365 = vector.broadcast %8 : f32 to vector<1x128xf32>
    %366 = arith.select %15, %365, %358 : vector<1x128xi1>, vector<1x128xf32>
    %367 = arith.select %17, %362, %359 : vector<1x128xi1>, vector<1x128xf32>
    %368 = vector.broadcast %20 : f32 to vector<1x128xf32>
    %369 = arith.mulf %368, %333 : vector<1x128xf32>
    %370 = vector.broadcast %3 : f32 to vector<1x128xf32>
    %371 = arith.mulf %370, %357 : vector<1x128xf32>
    %372 = arith.addf %364, %367 : vector<1x128xf32>
    %373 = vector.broadcast %6 : f32 to vector<1x128xf32>
    %374 = arith.mulf %373, %372 : vector<1x128xf32>
    %375 = arith.addf %369, %374 : vector<1x128xf32>
    %376 = arith.mulf %371, %375 : vector<1x128xf32>
    %377 = arith.addf %366, %367 : vector<1x128xf32>
    %378 = vector.broadcast %6 : f32 to vector<1x128xf32>
    %379 = arith.mulf %378, %377 : vector<1x128xf32>
    %380 = arith.addf %369, %379 : vector<1x128xf32>
    %381 = vector.broadcast %4 : f32 to vector<1x128xf32>
    %382 = arith.mulf %381, %380 : vector<1x128xf32>
    %383 = tpu.concatenate %376, %382 in 0 : vector<1x128xf32>, vector<1x128xf32> -> vector<2x128xf32>
    %c8_i32_59 = arith.constant 8 : i32
    %384 = arith.muli %arg0, %c8_i32_59 : i32
    %c5_i32 = arith.constant 5 : i32
    %385 = arith.addi %384, %c5_i32 : i32
    %386 = arith.index_cast %385 : i32 to index
    %387 = memref.load %arg2[%386] : memref<8xf32, #tpu.memory_space<smem>>
    %388 = vector.broadcast %387 : f32 to vector<2x128xf32>
    %389 = arith.mulf %388, %383 : vector<2x128xf32>
    %390 = arith.addf %329, %389 : vector<2x128xf32>
    %391 = vector.extract_strided_slice %390 {offsets = [0, 0], sizes = [2, 16], strides = [1, 1]} : vector<2x128xf32> to vector<2x16xf32>
    %392 = vector.shape_cast %391 : vector<2x16xf32> to vector<2x1x16xf32>
    %c0_60 = arith.constant 0 : index
    %c0_61 = arith.constant 0 : index
    %c80 = arith.constant 80 : index
    %393 = vector.load %arg9[%c0_60, %c0_61, %c80] : memref<2x1x128xf32, #tpu.memory_space<vmem>>, vector<2x1x16xf32>
    tpu.vector_store %arg9[%c0_60, %c0_61, %c80], %392 {strides = array<i32>} : memref<2x1x128xf32, #tpu.memory_space<vmem>>, vector<2x1x16xf32>,
    %394 = vector.extract_strided_slice %390 {offsets = [0, 0], sizes = [1, 128], strides = [1, 1]} : vector<2x128xf32> to vector<1x128xf32>
    %395 = vector.broadcast %21 : vector<32x1xf32> to vector<32x128xf32>
    %396 = vector.broadcast %394 : vector<1x128xf32> to vector<32x128xf32>
    %397 = arith.mulf %395, %396 : vector<32x128xf32>
    %398 = vector.broadcast %22 : vector<32x1xf32> to vector<32x128xf32>
    %399 = arith.addf %397, %398 : vector<32x128xf32>
    %400 = math.tanh %399 : vector<32x128xf32>
    %401 = arith.truncf %400 : vector<32x128xf32> to vector<32x128xbf16>
    %cst_62 = arith.constant dense<0.000000e+00> : vector<32x128xf32>
    %402 = tpu.matmul %24, %401, %cst_62 {dimension_numbers = #tpu.dot_dimension_numbers<[1], [0], [0], [1], [0, 0, 1, 1], [], []>} : vector<32x32xbf16>, vector<32x128xbf16>, vector<32x128xf32> -> vector<32x128xf32>
    %403 = vector.broadcast %25 : vector<32x1xf32> to vector<32x128xf32>
    %404 = arith.addf %402, %403 : vector<32x128xf32>
    %405 = math.tanh %404 : vector<32x128xf32>
    %406 = vector.broadcast %26 : vector<32x1xf32> to vector<32x128xf32>
    %407 = arith.mulf %406, %405 : vector<32x128xf32>
    %cst_63 = arith.constant dense<0.000000e+00> : vector<128xf32>
    %408 = vector.multi_reduction <add>, %407, %cst_63 [0] : vector<32x128xf32> to vector<128xf32>
    %409 = vector.shape_cast %408 : vector<128xf32> to vector<1x128xf32>
    %410 = vector.broadcast %12 : f32 to vector<1x128xf32>
    %411 = arith.addf %409, %410 : vector<1x128xf32>
    %412 = arith.negf %411 : vector<1x128xf32>
    %413 = math.exp %412 : vector<1x128xf32>
    %cst_64 = arith.constant 1.000000e+00 : f32
    %414 = vector.broadcast %cst_64 : f32 to vector<1x128xf32>
    %415 = arith.addf %414, %413 : vector<1x128xf32>
    %416 = arith.divf %414, %415 : vector<1x128xf32>
    %417 = vector.broadcast %9 : f32 to vector<1x128xf32>
    %418 = arith.mulf %416, %417 : vector<1x128xf32>
    %c1_i32_65 = arith.constant 1 : i32
    %419 = tpu.dynamic_rotate %394 by %c1_i32_65 dim 1 : vector<1x128xf32>, i32 -> vector<1x128xf32>
    %c127_i32_66 = arith.constant 127 : i32
    %420 = tpu.dynamic_rotate %394 by %c127_i32_66 dim 1 : vector<1x128xf32>, i32 -> vector<1x128xf32>
    %421 = arith.subf %419, %394 : vector<1x128xf32>
    %422 = vector.broadcast %19 : f32 to vector<1x128xf32>
    %423 = arith.mulf %422, %421 : vector<1x128xf32>
    %424 = vector.broadcast %7 : f32 to vector<1x128xf32>
    %425 = arith.select %15, %424, %419 : vector<1x128xi1>, vector<1x128xf32>
    %426 = vector.broadcast %8 : f32 to vector<1x128xf32>
    %427 = arith.select %15, %426, %419 : vector<1x128xi1>, vector<1x128xf32>
    %428 = arith.select %17, %423, %420 : vector<1x128xi1>, vector<1x128xf32>
    %429 = vector.broadcast %20 : f32 to vector<1x128xf32>
    %430 = arith.mulf %429, %394 : vector<1x128xf32>
    %431 = vector.broadcast %3 : f32 to vector<1x128xf32>
    %432 = arith.mulf %431, %418 : vector<1x128xf32>
    %433 = arith.addf %425, %428 : vector<1x128xf32>
    %434 = vector.broadcast %6 : f32 to vector<1x128xf32>
    %435 = arith.mulf %434, %433 : vector<1x128xf32>
    %436 = arith.addf %430, %435 : vector<1x128xf32>
    %437 = arith.mulf %432, %436 : vector<1x128xf32>
    %438 = arith.addf %427, %428 : vector<1x128xf32>
    %439 = vector.broadcast %6 : f32 to vector<1x128xf32>
    %440 = arith.mulf %439, %438 : vector<1x128xf32>
    %441 = arith.addf %430, %440 : vector<1x128xf32>
    %442 = vector.broadcast %4 : f32 to vector<1x128xf32>
    %443 = arith.mulf %442, %441 : vector<1x128xf32>
    %444 = tpu.concatenate %437, %443 in 0 : vector<1x128xf32>, vector<1x128xf32> -> vector<2x128xf32>
    %c8_i32_67 = arith.constant 8 : i32
    %445 = arith.muli %arg0, %c8_i32_67 : i32
    %c6_i32 = arith.constant 6 : i32
    %446 = arith.addi %445, %c6_i32 : i32
    %447 = arith.index_cast %446 : i32 to index
    %448 = memref.load %arg2[%447] : memref<8xf32, #tpu.memory_space<smem>>
    %449 = vector.broadcast %448 : f32 to vector<2x128xf32>
    %450 = arith.mulf %449, %444 : vector<2x128xf32>
    %451 = arith.addf %390, %450 : vector<2x128xf32>
    %452 = vector.extract_strided_slice %451 {offsets = [0, 0], sizes = [2, 16], strides = [1, 1]} : vector<2x128xf32> to vector<2x16xf32>
    %453 = vector.shape_cast %452 : vector<2x16xf32> to vector<2x1x16xf32>
    %c0_68 = arith.constant 0 : index
    %c0_69 = arith.constant 0 : index
    %c96 = arith.constant 96 : index
    %454 = vector.load %arg9[%c0_68, %c0_69, %c96] : memref<2x1x128xf32, #tpu.memory_space<vmem>>, vector<2x1x16xf32>
    tpu.vector_store %arg9[%c0_68, %c0_69, %c96], %453 {strides = array<i32>} : memref<2x1x128xf32, #tpu.memory_space<vmem>>, vector<2x1x16xf32>,
    %455 = vector.extract_strided_slice %451 {offsets = [0, 0], sizes = [1, 128], strides = [1, 1]} : vector<2x128xf32> to vector<1x128xf32>
    %456 = vector.broadcast %21 : vector<32x1xf32> to vector<32x128xf32>
    %457 = vector.broadcast %455 : vector<1x128xf32> to vector<32x128xf32>
    %458 = arith.mulf %456, %457 : vector<32x128xf32>
    %459 = vector.broadcast %22 : vector<32x1xf32> to vector<32x128xf32>
    %460 = arith.addf %458, %459 : vector<32x128xf32>
    %461 = math.tanh %460 : vector<32x128xf32>
    %462 = arith.truncf %461 : vector<32x128xf32> to vector<32x128xbf16>
    %cst_70 = arith.constant dense<0.000000e+00> : vector<32x128xf32>
    %463 = tpu.matmul %24, %462, %cst_70 {dimension_numbers = #tpu.dot_dimension_numbers<[1], [0], [0], [1], [0, 0, 1, 1], [], []>} : vector<32x32xbf16>, vector<32x128xbf16>, vector<32x128xf32> -> vector<32x128xf32>
    %464 = vector.broadcast %25 : vector<32x1xf32> to vector<32x128xf32>
    %465 = arith.addf %463, %464 : vector<32x128xf32>
    %466 = math.tanh %465 : vector<32x128xf32>
    %467 = vector.broadcast %26 : vector<32x1xf32> to vector<32x128xf32>
    %468 = arith.mulf %467, %466 : vector<32x128xf32>
    %cst_71 = arith.constant dense<0.000000e+00> : vector<128xf32>
    %469 = vector.multi_reduction <add>, %468, %cst_71 [0] : vector<32x128xf32> to vector<128xf32>
    %470 = vector.shape_cast %469 : vector<128xf32> to vector<1x128xf32>
    %471 = vector.broadcast %12 : f32 to vector<1x128xf32>
    %472 = arith.addf %470, %471 : vector<1x128xf32>
    %473 = arith.negf %472 : vector<1x128xf32>
    %474 = math.exp %473 : vector<1x128xf32>
    %cst_72 = arith.constant 1.000000e+00 : f32
    %475 = vector.broadcast %cst_72 : f32 to vector<1x128xf32>
    %476 = arith.addf %475, %474 : vector<1x128xf32>
    %477 = arith.divf %475, %476 : vector<1x128xf32>
    %478 = vector.broadcast %9 : f32 to vector<1x128xf32>
    %479 = arith.mulf %477, %478 : vector<1x128xf32>
    %c1_i32_73 = arith.constant 1 : i32
    %480 = tpu.dynamic_rotate %455 by %c1_i32_73 dim 1 : vector<1x128xf32>, i32 -> vector<1x128xf32>
    %c127_i32_74 = arith.constant 127 : i32
    %481 = tpu.dynamic_rotate %455 by %c127_i32_74 dim 1 : vector<1x128xf32>, i32 -> vector<1x128xf32>
    %482 = arith.subf %480, %455 : vector<1x128xf32>
    %483 = vector.broadcast %19 : f32 to vector<1x128xf32>
    %484 = arith.mulf %483, %482 : vector<1x128xf32>
    %485 = vector.broadcast %7 : f32 to vector<1x128xf32>
    %486 = arith.select %15, %485, %480 : vector<1x128xi1>, vector<1x128xf32>
    %487 = vector.broadcast %8 : f32 to vector<1x128xf32>
    %488 = arith.select %15, %487, %480 : vector<1x128xi1>, vector<1x128xf32>
    %489 = arith.select %17, %484, %481 : vector<1x128xi1>, vector<1x128xf32>
    %490 = vector.broadcast %20 : f32 to vector<1x128xf32>
    %491 = arith.mulf %490, %455 : vector<1x128xf32>
    %492 = vector.broadcast %3 : f32 to vector<1x128xf32>
    %493 = arith.mulf %492, %479 : vector<1x128xf32>
    %494 = arith.addf %486, %489 : vector<1x128xf32>
    %495 = vector.broadcast %6 : f32 to vector<1x128xf32>
    %496 = arith.mulf %495, %494 : vector<1x128xf32>
    %497 = arith.addf %491, %496 : vector<1x128xf32>
    %498 = arith.mulf %493, %497 : vector<1x128xf32>
    %499 = arith.addf %488, %489 : vector<1x128xf32>
    %500 = vector.broadcast %6 : f32 to vector<1x128xf32>
    %501 = arith.mulf %500, %499 : vector<1x128xf32>
    %502 = arith.addf %491, %501 : vector<1x128xf32>
    %503 = vector.broadcast %4 : f32 to vector<1x128xf32>
    %504 = arith.mulf %503, %502 : vector<1x128xf32>
    %505 = tpu.concatenate %498, %504 in 0 : vector<1x128xf32>, vector<1x128xf32> -> vector<2x128xf32>
    %c8_i32_75 = arith.constant 8 : i32
    %506 = arith.muli %arg0, %c8_i32_75 : i32
    %c7_i32 = arith.constant 7 : i32
    %507 = arith.addi %506, %c7_i32 : i32
    %508 = arith.index_cast %507 : i32 to index
    %509 = memref.load %arg2[%508] : memref<8xf32, #tpu.memory_space<smem>>
    %510 = vector.broadcast %509 : f32 to vector<2x128xf32>
    %511 = arith.mulf %510, %505 : vector<2x128xf32>
    %512 = arith.addf %451, %511 : vector<2x128xf32>
    %513 = vector.extract_strided_slice %512 {offsets = [0, 0], sizes = [2, 16], strides = [1, 1]} : vector<2x128xf32> to vector<2x16xf32>
    %514 = vector.shape_cast %513 : vector<2x16xf32> to vector<2x1x16xf32>
    %c0_76 = arith.constant 0 : index
    %c0_77 = arith.constant 0 : index
    %c112 = arith.constant 112 : index
    %515 = vector.load %arg9[%c0_76, %c0_77, %c112] : memref<2x1x128xf32, #tpu.memory_space<vmem>>, vector<2x1x16xf32>
    tpu.vector_store %arg9[%c0_76, %c0_77, %c112], %514 {strides = array<i32>} : memref<2x1x128xf32, #tpu.memory_space<vmem>>, vector<2x1x16xf32>,
    %c0_78 = arith.constant 0 : index
    %c0_79 = arith.constant 0 : index
    %516 = vector.load %arg10[%c0_78, %c0_79] : memref<2x128xf32, #tpu.memory_space<vmem>>, vector<2x128xf32>
    tpu.vector_store %arg10[%c0_78, %c0_79], %512 {strides = array<i32>} : memref<2x128xf32, #tpu.memory_space<vmem>>, vector<2x128xf32>,
    return
  }
  func.func @transform_0(%arg0: i32) -> i32 {
    %c0_i32 = arith.constant 0 : i32
    %c0_i32_0 = arith.constant 0 : i32
    return %c0_i32 : i32
  }
  func.func @transform_1(%arg0: i32) -> i32 {
    %c0_i32 = arith.constant 0 : i32
    %c0_i32_0 = arith.constant 0 : i32
    return %c0_i32 : i32
  }
  func.func @transform_2(%arg0: i32) -> (i32, i32) {
    %c0_i32 = arith.constant 0 : i32
    %c0_i32_0 = arith.constant 0 : i32
    %c0_i32_1 = arith.constant 0 : i32
    return %c0_i32, %c0_i32_0 : i32, i32
  }
  func.func @transform_3(%arg0: i32) -> (i32, i32) {
    %c0_i32 = arith.constant 0 : i32
    %c0_i32_0 = arith.constant 0 : i32
    %c0_i32_1 = arith.constant 0 : i32
    return %c0_i32, %c0_i32_0 : i32, i32
  }
  func.func @transform_4(%arg0: i32) -> (i32, i32) {
    %c0_i32 = arith.constant 0 : i32
    %c0_i32_0 = arith.constant 0 : i32
    %c0_i32_1 = arith.constant 0 : i32
    return %c0_i32, %c0_i32_0 : i32, i32
  }
  func.func @transform_5(%arg0: i32) -> (i32, i32) {
    %c0_i32 = arith.constant 0 : i32
    %c0_i32_0 = arith.constant 0 : i32
    %c0_i32_1 = arith.constant 0 : i32
    return %c0_i32, %c0_i32_0 : i32, i32
  }
  func.func @transform_6(%arg0: i32) -> (i32, i32) {
    %c0_i32 = arith.constant 0 : i32
    %c0_i32_0 = arith.constant 0 : i32
    %c0_i32_1 = arith.constant 0 : i32
    return %c0_i32, %c0_i32_0 : i32, i32
  }
  func.func @transform_7(%arg0: i32) -> (i32, i32) {
    %c0_i32 = arith.constant 0 : i32
    %c0_i32_0 = arith.constant 0 : i32
    %c0_i32_1 = arith.constant 0 : i32
    return %c0_i32, %c0_i32_0 : i32, i32
  }
  func.func @transform_8(%arg0: i32) -> (i32, i32, i32) {
    %c0_i32 = arith.constant 0 : i32
    %c0_i32_0 = arith.constant 0 : i32
    %c0_i32_1 = arith.constant 0 : i32
    return %c0_i32, %arg0, %c0_i32_0 : i32, i32, i32
  }
}

</mosaic_0001>

<bundles_post_ra>
// kernel: finn_diffsorp_forward.1
= control target key start
LH: loop header
LB: loop body
LE: loop exit
PB: predicated region body
PF: predicated region fallthrough
CT: control target
= control target key end

     0   :  { %13 = vsyncpa [#allocation4], 0  ;;  %s2016_s0 = inlined_call_operand.vmem [shape: f32[10], index: 0, kind: input, shape index: {}]   ;;  %s2017_s1 = inlined_call_operand.vmem [shape: f32[8], index: 1, kind: input, shape index: {}]   ;;  %s2018_s2 = inlined_call_operand.vmem [shape: f32[2,128], index: 2, kind: input, shape index: {}]   ;;  %s2019_s3 = inlined_call_operand.vmem [shape: f32[32,1], index: 3, kind: input, shape index: {}]   ;;  %s2020_s4 = inlined_call_operand.vmem [shape: f32[32,1], index: 4, kind: input, shape index: {}]   ;;  %s2021_s5 = inlined_call_operand.vmem [shape: f32[32,32], index: 5, kind: input, shape index: {}]   ;;  %s2022_s6 = inlined_call_operand.vmem [shape: f32[32,1], index: 6, kind: input, shape index: {}]   ;;  %s2023_s7 = inlined_call_operand.vmem [shape: f32[32,1], index: 7, kind: input, shape index: {}]   ;;  %s2024_s8 = inlined_call_operand.vmem [shape: f32[2,1,128], index: 8, kind: output, shape index: {}]  }
   0x1   :  { %s20_s29 = sshll.u32 %s2016_s0, 4  ;;  %s21_s29 = int_to_ptr.vmem [resolvable:$true] %s20_s29 }
   0x2   :  { %14 = vsyncpa [#allocation6], 0  ;;  %s29_s10 = sshll.u32 %s2017_s1, 4  ;;  %s1345_s11 = smov [#allocation3]   ;;  %s30_s10 = int_to_ptr.vmem [resolvable:$true] %s29_s10 }
   0x3   :  { %23 = dma.vmem_to_smem %s21_s29, 16, %s1345_s11, [#allocation4]  }
   0x4   :  { %s1346_s12 = smov [#allocation5]  }
   0x5   :  { %32 = dma.vmem_to_smem %s30_s10, 16, %s1346_s12, [#allocation6]  }
   0x6   :  { %1341 = dma.done.wait [#allocation4], 16  }
   0x7   :  { %1342 = vsyncadd [#allocation4], 4294967280 }
   0x8   :  { %1343 = dma.done.wait [#allocation6], 16  }
   0x9   :  { %1344 = vsyncadd [#allocation6], 4294967280 }
   0xa   :  { %53 = sfence }
   0xb   :  { %v84_v0 = vld [vmem:[%s2020_s4 + $0x10] sm:$0xff]  ;;  %v78_v2 = vld [vmem:[%s2019_s3] sm:$0xff]  ;;  %v1347_v3 = vmov 0   ;;  %v85_v4 = vld [vmem:[%s2020_s4 + $0x18] sm:$0xff]  ;;  %s1348_s18 = smov 1   ;;  %s1349_s19 = smov 127  }
   0xc   :  { %v80_v1 = vld [vmem:[%s2019_s3 + $0x10] sm:$0xff]  ;;  %1156 = vset.pattern.permute.xlu2 %v1347_v3  ;;  %1155 = vset.pattern.permute.xlu1 %v1347_v3  ;;  %v81_v5 = vld [vmem:[%s2019_s3 + $0x18] sm:$0xff]  ;;  %v79_v6 = vld [vmem:[%s2019_s3 + $0x8] sm:$0xff]  ;;  %vm176_vm0 = vcmask 261120   ;;  %s1534_s26 = sld [smem:[#allocation3]]  ;;  %vm291_vm7 = vcmask 1040384  }
   0xd   :  { %1154 = vset.pattern.permute.xlu0 %v1347_v3  ;;  %138 = vperm.xlu1 %1155, %v84_v0   ;;  %v83_v7 = vld [vmem:[%s2020_s4 + $0x8] sm:$0xff]  ;;  %v82_v8 = vld [vmem:[%s2020_s4] sm:$0xff]  ;;  %v94_v10 = vld [vmem:[%s2022_s6 + $0x10] sm:$0xff]  ;;  %s1108_s27 = sld [smem:[#allocation3 + $0x7]]  ;;  %vm301_vm8 = vcmask 122880   ;;  %s1350_s21 = smov 16  }
   0xe   :  { %113 = vperm.xlu0 %1154, %v80_v1   ;;  %103 = vperm.xlu2 %1156, %v78_v2   ;;  %v92_v9 = vld [vmem:[%s2022_s6] sm:$0xff]  ;;  %v93_v11 = vld [vmem:[%s2022_s6 + $0x8] sm:$0xff]  ;;  %v95_v12 = vld [vmem:[%s2022_s6 + $0x18] sm:$0xff]  ;;  %s1109_s28 = sld [smem:[#allocation3 + $0x8]]  ;;  %s1351_s22 = smov 32  }
   0xf   :  { %v97_v13 = vld [vmem:[%s2023_s7 + $0x8] sm:$0xff]  ;;  %v96_v14 = vld [vmem:[%s2023_s7] sm:$0xff]  ;;  %v98_v15 = vld [vmem:[%s2023_s7 + $0x10] sm:$0xff]  ;;  %s1106_s3 = sld [smem:[#allocation3 + $0x5]]  ;;  %s1352_s23 = smov 64  }
  0x10   :  { %v99_v16 = vld [vmem:[%s2023_s7 + $0x18] sm:$0xff]  ;;  %v59_v17 = vld [vmem:[%s2018_s2] sm:$0x3]  ;;  %v87_v41 = vld [vmem:[%s2021_s5 + $0x8] sm:$0xff]  ;;  %s1103_s9 = sld [smem:[#allocation3 + $0x2]]  ;;  %s1353_s24 = smov 80  }
  0x11   :  { %60 = vst [vmem:[#allocation2] sm:$0x3] %v59_v17  ;;  %v86_v40 = vld [vmem:[%s2021_s5] sm:$0xff]  ;;  %v88_v45 = vld [vmem:[%s2021_s5 + $0x10] sm:$0xff]  ;;  %v89_v46 = vld [vmem:[%s2021_s5 + $0x18] sm:$0xff]  ;;  %s1110_s5 = sld [smem:[#allocation3 + $0x9]] }
  0x12   :  { %v1496_v44 = vpack.c.bf16 %v87_v41, %v86_v40  ;;  %v1506_v47 = vpack.c.bf16 %v89_v46, %v88_v45  ;;  %s1105_s10 = sld [smem:[#allocation3 + $0x4]] }
  0x13   :  { %s75_s29 = smul.f32 %s1108_s27, %s1534_s26  ;;  %s1104_s11 = sld [smem:[#allocation3 + $0x3]] }
  0x14   :  { %s1102_s12 = sld [smem:[#allocation3 + $0x1]] }
  0x15   :  { %143 = vperm.xlu1 %1155, %v85_v4   ;;  %s76_s30 = smul.f32 %s1109_s28, %s75_s29  ;;  %s1107_s13 = sld [smem:[#allocation3 + $0x6]] }
  0x16   :  { %118 = vperm.xlu0 %1154, %v81_v5   ;;  %108 = vperm.xlu2 %1156, %v79_v6   ;;  %s77_s4 = smul.f32 2.0, %s1103_s9  ;;  %s294_s14 = sld [smem:[#allocation5]] }
  0x17   :  { %s1117_s1 = sld [smem:[#allocation5 + $0x1]] }
  0x18   :  { %v1459_v18 = vld [vmem:[#allocation2] sm:$0x3]  ;;  %v1555_v41 = vstv %s1105_s10  ;;  %v1557_v45 = vstv %s77_s4  ;;  %s1121_s17 = sld [smem:[#allocation5 + $0x2]] }
  0x19   :  { %v121_v21 = vperm.slane %v1459_v18, 0  ;;  %v1559_v46 = vstv %s1104_s11  ;;  %s1125_s2 = sld [smem:[#allocation5 + $0x3]] }
  0x1a   :  { %s1129_s7 = sld [smem:[#allocation5 + $0x4]] }
  0x1b   :  { %s1133_s20 = sld [smem:[#allocation5 + $0x5]] }
  0x1d   :  { %133 = vperm.xlu1 %1155, %v83_v7  }
  0x1e   :  { %128 = vperm.xlu0 %1154, %v82_v8   ;;  %158 = vperm.xlu2 %1156, %v92_v9  }
  0x25   :  { %168 = vperm.xlu1 %1155, %v94_v10  }
  0x26   :  { %163 = vperm.xlu0 %1154, %v93_v11   ;;  %173 = vperm.xlu2 %1156, %v95_v12  }
  0x2d   :  { %213 = vperm.xlu1 %1155, %v97_v13  }
  0x2e   :  { %208 = vperm.xlu0 %1154, %v96_v14   ;;  %218 = vperm.xlu2 %1156, %v98_v15  }
  0x35   :  { %262 = vrot.lane.b32.xlu1 %v1459_v18, %s1348_s18 }
  0x36   :  { %223 = vperm.xlu0 %1154, %v99_v16   ;;  %264 = vrot.lane.b32.xlu2 %v1459_v18, %s1349_s19  ;;  %v1536_v16 = vstv %s1110_s5 }
  0x68   :  { %v1470_v22 = vpop.permute.xlu2 %103 }
  0x69   :  { %v122_v32 = vmul.f32 %v121_v21, %v1470_v22 }
  0x70   :  { %v1480_v29 = vpop.permute.xlu2 %108 }
  0x71   :  { %v123_v30 = vmul.f32 %v121_v21, %v1480_v29 }
  0x78   :  { %v1510_v50 = vpop.permute.xlu2 %158 }
  0x7f   :  { %v1465_v19 = vpop.permute.xlu1 %138 }
  0x80   :  { %v1467_v20 = vpop.permute.xlu0 %113  ;;  %v1519_v57 = vpop.permute.xlu2 %173 }
  0x81   :  { %v124_v23 = vmul.f32 %v121_v21, %v1467_v20 }
  0x83   :  { %v148_v26 = vadd.f32 %v1465_v19, %v124_v23 }
  0x85   :  { %1157 = vtanh.f32 %v148_v26  ;;  %v71_v26 = vlaneseq }
  0x87   :  { %v1473_v24 = vpop.permute.xlu1 %143 }
  0x88   :  { %v1475_v25 = vpop.permute.xlu0 %118  ;;  %v1527_v2 = vpop.permute.xlu2 %218 }
  0x89   :  { %v125_v27 = vmul.f32 %v121_v21, %v1475_v25 }
  0x8b   :  { %v149_v28 = vadd.f32 %v1473_v24, %v125_v27  ;;  %v1158_v36 = vpop.eup %1157 }
  0x8d   :  { %1159 = vtanh.f32 %v149_v28 }
  0x8f   :  { %v1483_v31 = vpop.permute.xlu1 %133 }
  0x90   :  { %v1486_v33 = vpop.permute.xlu0 %128  ;;  %v147_v34 = vadd.f32 %v1483_v31, %v123_v30  ;;  %v1541_v30 = vand.u32 127, %v71_v26 }
  0x91   :  { %v146_v35 = vadd.f32 %v1486_v33, %v122_v32  ;;  %v1543_v32 = vstv %s76_s30 }
  0x92   :  { %1161 = vtanh.f32 %v147_v34  ;;  %vm73_vm1 = vcmp.eq.s32.totalorder %v1541_v30, 0  ;;  %vm74_vm2 = vcmp.eq.s32.totalorder %v1541_v30, 15 }
  0x93   :  { %v1160_v37 = vpop.eup %1159  ;;  %1163 = vtanh.f32 %v146_v35 }
  0x94   :  { %v155_v38 = vpack.c.bf16 %v1160_v37, %v1158_v36  ;;  %v1547_v37 = vstv %s1106_s3 }
  0x96   :  { %189 = vmatpush.bf16.msra.mxu0 %v155_v38  ;;  %v265_v38 = vpop.permute.xlu2 %264 }
  0x97   :  { %v1515_v53 = vpop.permute.xlu1 %168 }
  0x98   :  { %v1162_v39 = vpop.eup %1161  ;;  %v1512_v51 = vpop.permute.xlu0 %163 }
  0x99   :  { %v1164_v42 = vpop.eup %1163 }
  0x9a   :  { %v154_v43 = vpack.c.bf16 %v1162_v39, %v1164_v42 }
  0x9c   :  { %190 = vmatpush.bf16.msra.mxu0 %v154_v43 }
  0x9f   :  { %1111 = vmatmul.msk.bf16.vlgmr.msra.gmra.mxu0 %vm176_vm0, %v1496_v44  ;;  %v1524_v0 = vpop.permute.xlu1 %213 }
  0xa0   :  { %v1521_v58 = vpop.permute.xlu0 %208 }
  0xa7   :  { %v263_v27 = vpop.permute.xlu1 %262 }
  0xa8   :  { %v1531_v7 = vpop.permute.xlu0 %223  ;;  %v266_v28 = vsub.f32 %v263_v27, %v1459_v18  ;;  %v272_v39 = vsel %vm73_vm1, %v1547_v37, %v263_v27 }
  0xaa   :  { %v268_v36 = vmul.f32 %v1543_v32, %v266_v28 }
  0xac   :  { %v273_v40 = vsel %vm74_vm2, %v268_v36, %v265_v38 }
  0xad   :  { %v283_v42 = vadd.f32 %v273_v40, %v272_v39 }
  0xaf   :  { %1112 = vmatmul.msk.bf16.gmra.mxu0 %vm176_vm0, %v1506_v47 }
 0x11c   :  { %v192_v48 = vpop.f32.mrf.mxu0 }
 0x11d   :  { %v193_v54 = vadd.f32 %v192_v48, %v1510_v50 }
 0x124   :  { %v194_v49 = vpop.f32.mrf.mxu0 }
 0x125   :  { %v195_v52 = vadd.f32 %v194_v49, %v1512_v51  ;;  %v270_v49 = vsel %vm73_vm1, %v1555_v41, %v263_v27 }
 0x127   :  { %1165 = vtanh.f32 %v195_v52 }
 0x128   :  { %1167 = vtanh.f32 %v193_v54  ;;  %v275_v54 = vmul.f32 %v1557_v45, %v1459_v18 }
 0x12c   :  { %v197_v55 = vpop.f32.mrf.mxu0 }
 0x12d   :  { %v198_v56 = vadd.f32 %v197_v55, %v1515_v53  ;;  %v1166_v60 = vpop.eup %1165  ;;  %v284_v55 = vmul.f32 %v283_v42, %v1559_v46 }
 0x12e   :  { %v1168_v62 = vpop.eup %1167  ;;  %v227_v1 = vmul.f32 %v1166_v60, %v1524_v0 }
 0x12f   :  { %1169 = vtanh.f32 %v198_v56  ;;  %v226_v3 = vmul.f32 %v1168_v62, %v1521_v58 }
 0x131   :  { %v230_v5 = vadd.f32 %v227_v1, %v226_v3  ;;  %v1567_v1 = vstv %s1107_s13  ;;  %v1569_v3 = vstv %s1102_s12 }
 0x134   :  { %v199_v59 = vpop.f32.mrf.mxu0 }
 0x135   :  { %v200_v61 = vadd.f32 %v199_v59, %v1519_v57  ;;  %v1170_v63 = vpop.eup %1169 }
 0x136   :  { %v228_v4 = vmul.f32 %v1170_v63, %v1527_v2  ;;  %v285_v63 = vadd.f32 %v284_v55, %v275_v54 }
 0x137   :  { %1171 = vtanh.f32 %v200_v61  ;;  %v278_v61 = vadd.f32 %v273_v40, %v270_v49 }
 0x138   :  { %v231_v8 = vadd.f32 %v230_v5, %v228_v4 }
 0x13d   :  { %v1172_v6 = vpop.eup %1171 }
 0x13e   :  { %v229_v9 = vmul.f32 %v1172_v6, %v1531_v7  ;;  %v280_v6 = vmul.f32 %v1559_v46, %v278_v61 }
 0x140   :  { %v232_v10 = vadd.f32 %v231_v8, %v229_v9  ;;  %v1573_v8 = vstv %s1534_s26  ;;  %s1137_s26 = sld [smem:[#allocation5 + $0x6]] }
 0x142   :  { %v233_v11 = vrot.slane %v232_v10, 4 }
 0x144   :  { %v234_v12 = vadd.f32 %v233_v11, %v232_v10  ;;  %v287_v11 = vmul.f32 %v1569_v3, %v285_v63 }
 0x146   :  { %v235_v13 = vrot.slane %v234_v12, 2 }
 0x148   :  { %v236_v14 = vadd.f32 %v235_v13, %v234_v12  ;;  %v281_v13 = vadd.f32 %v280_v6, %v275_v54 }
 0x14a   :  { %v237_v15 = vrot.slane %v236_v14, 1 }
 0x14c   :  { %v238_v17 = vadd.f32 %v237_v15, %v236_v14  ;;  %v295_v14 = vstv %s294_s14 }
 0x14e   :  { %v240_v21 = vadd.f32 %v1536_v16, %v238_v17  ;;  %v289_v17 = vrot.slane %v287_v11, 7 }
 0x150   :  { %v1113_v23 = vmul.f32 -1.442695, %v240_v21 }
 0x152   :  { %1173 = vpow2.f32 %v1113_v23 }
 0x158   :  { %v1174_v34 = vpop.eup %1173 }
 0x159   :  { %v244_v35 = vadd.f32 1.0, %v1174_v34 }
 0x15b   :  { %1175 = vrcp.f32 %v244_v35  ;;  %v256_v56 = vand.u32 2147483648, %v244_v35  ;;  %v254_v60 = vand.u32 2147483647, %v244_v35  ;;  %vm250_vm4 = vweird.f32 %v244_v35 }
 0x15d   :  { %v257_v4 = vor.u32 1.1754944e-38, %v256_v56  ;;  %vm255_vm6 = vcmp.eq.f32.partialorder %v254_v60, 8.507059e+37 }
 0x161   :  { %v1176_v43 = vpop.eup %1175 }
 0x162   :  { %v246_v48 = vmul.f32 %v1176_v43, %v244_v35  ;;  %vm251_vm3 = vweird.f32 %v1176_v43 }
 0x163   :  { %vm252_vm5 = vmor %vm250_vm4, %vm251_vm3 }
 0x164   :  { %v247_v52 = vsub.f32 1.0, %v246_v48 }
 0x166   :  { %v248_v59 = vmul.f32 %v1176_v43, %v247_v52 }
 0x168   :  { %v249_v62 = vadd.f32 %v1176_v43, %v248_v59 }
 0x16a   :  { %v253_v5 = vsel %vm252_vm5, %v1176_v43, %v249_v62 }
 0x16b   :  { %v258_v9 = vsel %vm255_vm6, %v257_v4, %v253_v5 }
 0x16c   :  { %v261_v10 = vmul.f32 %v1567_v1, %v258_v9 }
 0x16e   :  { %v277_v12 = vmul.f32 %v1573_v8, %v261_v10 }
 0x170   :  { %v282_v15 = vmul.f32 %v281_v13, %v277_v12 }
 0x172   :  { %v292_v21 = vsel %vm291_vm7, %v282_v15, %v289_v17 }
 0x173   :  { %v296_v23 = vmul.f32 %v295_v14, %v292_v21 }
 0x175   :  { %v1580_v26 = vadd.f32 %v296_v23, %v1459_v18 }
 0x177   :  { %378 = vrot.lane.b32.xlu1 %v1580_v26, %s1349_s19  ;;  %376 = vrot.lane.b32.xlu0 %v1580_v26, %s1348_s18  ;;  %v304_v27 = vperm.slane %v1580_v26, 0  ;;  %302 = vst.msk [vmem:[%s2024_s8] sm:$0x1] %vm301_vm8, %v1580_v26  ;;  %v299_v28 = vrot.slane %v1580_v26, 1 }
 0x179   :  { %v307_v34 = vmul.f32 %v304_v27, %v1467_v20  ;;  %v308_v18 = vmul.f32 %v304_v27, %v1475_v25  ;;  %v305_v35 = vmul.f32 %v304_v27, %v1470_v22  ;;  %v306_v36 = vmul.f32 %v304_v27, %v1480_v29  ;;  %303 = vst.msk [vmem:[%s2024_s8 + $0x1] sm:$0x1] %vm301_vm8, %v299_v28 }
 0x17b   :  { %v311_v38 = vadd.f32 %v307_v34, %v1465_v19  ;;  %v312_v39 = vadd.f32 %v308_v18, %v1473_v24  ;;  %v309_v40 = vadd.f32 %v305_v35, %v1486_v33  ;;  %v310_v42 = vadd.f32 %v306_v36, %v1483_v31 }
 0x17d   :  { %1177 = vtanh.f32 %v311_v38 }
 0x17e   :  { %1179 = vtanh.f32 %v312_v39 }
 0x17f   :  { %1181 = vtanh.f32 %v309_v40 }
 0x180   :  { %1183 = vtanh.f32 %v310_v42 }
 0x183   :  { %v1178_v43 = vpop.eup %1177 }
 0x184   :  { %v1180_v48 = vpop.eup %1179 }
 0x185   :  { %v1182_v49 = vpop.eup %1181  ;;  %v318_v52 = vpack.c.bf16 %v1180_v48, %v1178_v43 }
 0x186   :  { %v1184_v54 = vpop.eup %1183 }
 0x187   :  { %325 = vmatpush.bf16.msra.mxu1 %v318_v52  ;;  %v317_v55 = vpack.c.bf16 %v1184_v54, %v1182_v49 }
 0x18b   :  { %326 = vmatpush.bf16.msra.mxu1 %v317_v55 }
 0x18e   :  { %1114 = vmatmul.msk.bf16.vlgmr.msra.gmra.mxu1 %vm176_vm0, %v1496_v44 }
 0x19e   :  { %1115 = vmatmul.msk.bf16.gmra.mxu1 %vm176_vm0, %v1506_v47 }
 0x1e9   :  { %v377_v40 = vpop.permute.xlu0 %376  ;;  %v379_v52 = vpop.permute.xlu1 %378 }
 0x1ea   :  { %v380_v42 = vsub.f32 %v377_v40, %v1580_v26  ;;  %v383_v55 = vsel %vm73_vm1, %v1547_v37, %v377_v40 }
 0x1ec   :  { %v381_v48 = vmul.f32 %v380_v42, %v1543_v32 }
 0x1ee   :  { %v384_v54 = vsel %vm74_vm2, %v381_v48, %v379_v52 }
 0x20b   :  { %v328_v56 = vpop.f32.mrf.mxu1 }
 0x20c   :  { %v329_v61 = vadd.f32 %v328_v56, %v1510_v50  ;;  %v391_v56 = vadd.f32 %v384_v54, %v383_v55 }
 0x213   :  { %v330_v59 = vpop.f32.mrf.mxu1 }
 0x214   :  { %v331_v60 = vadd.f32 %v330_v59, %v1512_v51 }
 0x216   :  { %1185 = vtanh.f32 %v331_v60 }
 0x217   :  { %1187 = vtanh.f32 %v329_v61  ;;  %v392_v61 = vmul.f32 %v391_v56, %v1559_v46 }
 0x21b   :  { %v333_v62 = vpop.f32.mrf.mxu1 }
 0x21c   :  { %v334_v63 = vadd.f32 %v333_v62, %v1515_v53  ;;  %v1186_v5 = vpop.eup %1185 }
 0x21d   :  { %v1188_v9 = vpop.eup %1187  ;;  %v343_v11 = vmul.f32 %v1186_v5, %v1524_v0 }
 0x21e   :  { %1189 = vtanh.f32 %v334_v63  ;;  %v342_v12 = vmul.f32 %v1188_v9, %v1521_v58  ;;  %v382_v63 = vsel %vm73_vm1, %v1555_v41, %v377_v40 }
 0x220   :  { %v346_v14 = vadd.f32 %v343_v11, %v342_v12 }
 0x223   :  { %v335_v4 = vpop.f32.mrf.mxu1 }
 0x224   :  { %v336_v6 = vadd.f32 %v335_v4, %v1519_v57  ;;  %v1190_v10 = vpop.eup %1189  ;;  %v385_v4 = vmul.f32 %v1580_v26, %v1557_v45 }
 0x225   :  { %v344_v13 = vmul.f32 %v1190_v10, %v1527_v2 }
 0x226   :  { %1191 = vtanh.f32 %v336_v6  ;;  %v387_v6 = vadd.f32 %v384_v54, %v382_v63  ;;  %v393_v11 = vadd.f32 %v392_v61, %v385_v4 }
 0x227   :  { %v347_v17 = vadd.f32 %v346_v14, %v344_v13 }
 0x228   :  { %v388_v14 = vmul.f32 %v387_v6, %v1559_v46 }
 0x22c   :  { %v1192_v15 = vpop.eup %1191 }
 0x22d   :  { %v345_v21 = vmul.f32 %v1192_v15, %v1531_v7 }
 0x22f   :  { %v348_v23 = vadd.f32 %v347_v17, %v345_v21  ;;  %v394_v21 = vmul.f32 %v393_v11, %v1569_v3 }
 0x231   :  { %v349_v27 = vrot.slane %v348_v23, 4 }
 0x233   :  { %v350_v28 = vadd.f32 %v349_v27, %v348_v23  ;;  %v389_v27 = vadd.f32 %v388_v14, %v385_v4 }
 0x235   :  { %v351_v34 = vrot.slane %v350_v28, 2 }
 0x237   :  { %v352_v18 = vadd.f32 %v351_v34, %v350_v28  ;;  %v396_v34 = vrot.slane %v394_v21, 7 }
 0x239   :  { %v353_v35 = vrot.slane %v352_v18, 1 }
 0x23b   :  { %v354_v36 = vadd.f32 %v353_v35, %v352_v18  ;;  %v401_v35 = vstv %s1117_s1 }
 0x23d   :  { %v355_v38 = vadd.f32 %v354_v36, %v1536_v16 }
 0x23f   :  { %v1116_v39 = vmul.f32 -1.442695, %v355_v38 }
 0x241   :  { %1193 = vpow2.f32 %v1116_v39 }
 0x247   :  { %v1194_v43 = vpop.eup %1193 }
 0x248   :  { %v359_v49 = vadd.f32 1.0, %v1194_v43 }
 0x24a   :  { %1195 = vrcp.f32 %v359_v49  ;;  %v371_v5 = vand.u32 2147483648, %v359_v49  ;;  %v369_v10 = vand.u32 2147483647, %v359_v49  ;;  %vm365_vm10 = vweird.f32 %v359_v49 }
 0x24c   :  { %v372_v13 = vor.u32 1.1754944e-38, %v371_v5  ;;  %vm370_vm12 = vcmp.eq.f32.partialorder %v369_v10, 8.507059e+37 }
 0x250   :  { %v1196_v59 = vpop.eup %1195 }
 0x251   :  { %v361_v60 = vmul.f32 %v1196_v59, %v359_v49  ;;  %vm366_vm9 = vweird.f32 %v1196_v59 }
 0x252   :  { %vm367_vm11 = vmor %vm365_vm10, %vm366_vm9 }
 0x253   :  { %v362_v62 = vsub.f32 1.0, %v361_v60 }
 0x255   :  { %v363_v9 = vmul.f32 %v1196_v59, %v362_v62 }
 0x257   :  { %v364_v12 = vadd.f32 %v1196_v59, %v363_v9 }
 0x259   :  { %v368_v15 = vsel %vm367_vm11, %v1196_v59, %v364_v12 }
 0x25a   :  { %v373_v17 = vsel %vm370_vm12, %v372_v13, %v368_v15 }
 0x25b   :  { %v375_v23 = vmul.f32 %v373_v17, %v1567_v1 }
 0x25d   :  { %v386_v28 = vmul.f32 %v375_v23, %v1573_v8 }
 0x25f   :  { %v390_v18 = vmul.f32 %v389_v27, %v386_v28 }
 0x261   :  { %v398_v36 = vsel %vm291_vm7, %v390_v18, %v396_v34 }
 0x262   :  { %v402_v38 = vmul.f32 %v401_v35, %v398_v36 }
 0x264   :  { %v1635_v39 = vadd.f32 %v402_v38, %v1580_v26 }
 0x266   :  { %491 = vrot.lane.b32.xlu0 %v1635_v39, %s1349_s19  ;;  %489 = vrot.lane.b32.xlu2 %v1635_v39, %s1348_s18  ;;  %v1642_v40 = vperm.slane %v1635_v39, 0 }
 0x268   :  { %v420_v42 = vmul.f32 %v1642_v40, %v1467_v20  ;;  %v421_v43 = vmul.f32 %v1642_v40, %v1475_v25  ;;  %v418_v48 = vmul.f32 %v1642_v40, %v1470_v22  ;;  %v419_v26 = vmul.f32 %v1642_v40, %v1480_v29 }
 0x26a   :  { %v424_v49 = vadd.f32 %v420_v42, %v1465_v19  ;;  %v425_v52 = vadd.f32 %v421_v43, %v1473_v24  ;;  %v422_v54 = vadd.f32 %v418_v48, %v1486_v33  ;;  %v423_v55 = vadd.f32 %v419_v26, %v1483_v31 }
 0x26c   :  { %1197 = vtanh.f32 %v424_v49 }
 0x26d   :  { %1199 = vtanh.f32 %v425_v52 }
 0x26e   :  { %1201 = vtanh.f32 %v422_v54 }
 0x26f   :  { %1203 = vtanh.f32 %v423_v55 }
 0x272   :  { %v1198_v56 = vpop.eup %1197 }
 0x273   :  { %v1200_v59 = vpop.eup %1199 }
 0x274   :  { %v1202_v60 = vpop.eup %1201  ;;  %v431_v61 = vpack.c.bf16 %v1200_v59, %v1198_v56 }
 0x275   :  { %v1204_v62 = vpop.eup %1203 }
 0x276   :  { %438 = vmatpush.bf16.msra.mxu2 %v431_v61  ;;  %v430_v63 = vpack.c.bf16 %v1204_v62, %v1202_v60 }
 0x27a   :  { %439 = vmatpush.bf16.msra.mxu2 %v430_v63 }
 0x27d   :  { %1118 = vmatmul.msk.bf16.vlgmr.msra.gmra.mxu2 %vm176_vm0, %v1496_v44 }
 0x28d   :  { %1119 = vmatmul.msk.bf16.gmra.mxu2 %vm176_vm0, %v1506_v47 }
 0x2c0   :  { %v490_v55 = vpop.permute.xlu2 %489 }
 0x2c1   :  { %v493_v56 = vsub.f32 %v490_v55, %v1635_v39 }
 0x2c3   :  { %v494_v62 = vmul.f32 %v493_v56, %v1543_v32 }
 0x2d8   :  { %v492_v61 = vpop.permute.xlu0 %491 }
 0x2d9   :  { %v497_v63 = vsel %vm74_vm2, %v494_v62, %v492_v61 }
 0x300   :  { %v441_v4 = vpop.f32.mrf.mxu2 }
 0x301   :  { %v442_v9 = vadd.f32 %v441_v4, %v1510_v50  ;;  %v496_v4 = vsel %vm73_vm1, %v1547_v37, %v490_v55 }
 0x308   :  { %v443_v5 = vpop.f32.mrf.mxu2 }
 0x309   :  { %v444_v6 = vadd.f32 %v443_v5, %v1512_v51  ;;  %v504_v5 = vadd.f32 %v497_v63, %v496_v4 }
 0x30b   :  { %1205 = vtanh.f32 %v444_v6 }
 0x30c   :  { %1207 = vtanh.f32 %v442_v9 }
 0x310   :  { %v446_v10 = vpop.f32.mrf.mxu2 }
 0x311   :  { %v447_v11 = vadd.f32 %v446_v10, %v1515_v53  ;;  %v1206_v13 = vpop.eup %1205  ;;  %v505_v10 = vmul.f32 %v504_v5, %v1559_v46 }
 0x312   :  { %v1208_v15 = vpop.eup %1207  ;;  %v456_v21 = vmul.f32 %v1206_v13, %v1524_v0  ;;  %v498_v13 = vmul.f32 %v1635_v39, %v1557_v45 }
 0x313   :  { %1209 = vtanh.f32 %v447_v11  ;;  %v455_v23 = vmul.f32 %v1208_v15, %v1521_v58 }
 0x315   :  { %v459_v28 = vadd.f32 %v456_v21, %v455_v23  ;;  %v506_v23 = vadd.f32 %v505_v10, %v498_v13 }
 0x318   :  { %v448_v12 = vpop.f32.mrf.mxu2 }
 0x319   :  { %v449_v14 = vadd.f32 %v448_v12, %v1519_v57  ;;  %v1210_v17 = vpop.eup %1209  ;;  %v495_v12 = vsel %vm73_vm1, %v1555_v41, %v490_v55 }
 0x31a   :  { %v457_v27 = vmul.f32 %v1210_v17, %v1527_v2  ;;  %v500_v15 = vadd.f32 %v497_v63, %v495_v12 }
 0x31b   :  { %1211 = vtanh.f32 %v449_v14 }
 0x31c   :  { %v460_v18 = vadd.f32 %v459_v28, %v457_v27 }
 0x321   :  { %v1212_v34 = vpop.eup %1211 }
 0x322   :  { %v458_v35 = vmul.f32 %v1212_v34, %v1531_v7  ;;  %v501_v34 = vmul.f32 %v500_v15, %v1559_v46 }
 0x324   :  { %v461_v36 = vadd.f32 %v460_v18, %v458_v35 }
 0x326   :  { %v462_v38 = vrot.slane %v461_v36, 4 }
 0x328   :  { %v463_v42 = vadd.f32 %v462_v38, %v461_v36  ;;  %v507_v36 = vmul.f32 %v506_v23, %v1569_v3 }
 0x32a   :  { %v464_v43 = vrot.slane %v463_v42, 2 }
 0x32c   :  { %v465_v48 = vadd.f32 %v464_v43, %v463_v42  ;;  %v502_v42 = vadd.f32 %v501_v34, %v498_v13 }
 0x32e   :  { %v466_v26 = vrot.slane %v465_v48, 1 }
 0x330   :  { %v467_v49 = vadd.f32 %v466_v26, %v465_v48  ;;  %v509_v48 = vrot.slane %v507_v36, 7 }
 0x332   :  { %v468_v52 = vadd.f32 %v467_v49, %v1536_v16  ;;  %v514_v49 = vstv %s1121_s17 }
 0x334   :  { %v1120_v54 = vmul.f32 -1.442695, %v468_v52 }
 0x336   :  { %1213 = vpow2.f32 %v1120_v54 }
 0x33c   :  { %v1214_v59 = vpop.eup %1213 }
 0x33d   :  { %v472_v60 = vadd.f32 1.0, %v1214_v59 }
 0x33f   :  { %1215 = vrcp.f32 %v472_v60  ;;  %v484_v14 = vand.u32 2147483648, %v472_v60  ;;  %v482_v21 = vand.u32 2147483647, %v472_v60  ;;  %vm478_vm14 = vweird.f32 %v472_v60 }
 0x341   :  { %v485_v28 = vor.u32 1.1754944e-38, %v484_v14  ;;  %vm483_vm3 = vcmp.eq.f32.partialorder %v482_v21, 8.507059e+37 }
 0x345   :  { %v1216_v6 = vpop.eup %1215 }
 0x346   :  { %v474_v9 = vmul.f32 %v1216_v6, %v472_v60  ;;  %vm479_vm13 = vweird.f32 %v1216_v6 }
 0x347   :  { %vm480_vm15 = vmor %vm478_vm14, %vm479_vm13 }
 0x348   :  { %v475_v11 = vsub.f32 1.0, %v474_v9 }
 0x34a   :  { %v476_v17 = vmul.f32 %v1216_v6, %v475_v11 }
 0x34c   :  { %v477_v27 = vadd.f32 %v1216_v6, %v476_v17 }
 0x34e   :  { %v481_v18 = vsel %vm480_vm15, %v1216_v6, %v477_v27 }
 0x34f   :  { %v486_v35 = vsel %vm483_vm3, %v485_v28, %v481_v18 }
 0x350   :  { %v488_v38 = vmul.f32 %v486_v35, %v1567_v1 }
 0x352   :  { %v499_v43 = vmul.f32 %v488_v38, %v1573_v8 }
 0x354   :  { %v503_v26 = vmul.f32 %v502_v42, %v499_v43 }
 0x356   :  { %v511_v52 = vsel %vm291_vm7, %v503_v26, %v509_v48 }
 0x357   :  { %v515_v54 = vmul.f32 %v514_v49, %v511_v52 }
 0x359   :  { %v1688_v55 = vadd.f32 %v515_v54, %v1635_v39 }
 0x35b   :  { %604 = vrot.lane.b32.xlu2 %v1688_v55, %s1349_s19  ;;  %602 = vrot.lane.b32.xlu1 %v1688_v55, %s1348_s18  ;;  %v1695_v56 = vperm.slane %v1688_v55, 0 }
 0x35d   :  { %v533_v59 = vmul.f32 %v1695_v56, %v1467_v20  ;;  %v534_v60 = vmul.f32 %v1695_v56, %v1475_v25  ;;  %v531_v61 = vmul.f32 %v1695_v56, %v1470_v22  ;;  %v532_v62 = vmul.f32 %v1695_v56, %v1480_v29 }
 0x35f   :  { %v537_v63 = vadd.f32 %v533_v59, %v1465_v19  ;;  %v538_v4 = vadd.f32 %v534_v60, %v1473_v24  ;;  %v535_v5 = vadd.f32 %v531_v61, %v1486_v33  ;;  %v536_v6 = vadd.f32 %v532_v62, %v1483_v31 }
 0x361   :  { %1217 = vtanh.f32 %v537_v63 }
 0x362   :  { %1219 = vtanh.f32 %v538_v4 }
 0x363   :  { %1221 = vtanh.f32 %v535_v5 }
 0x364   :  { %1223 = vtanh.f32 %v536_v6 }
 0x367   :  { %v1218_v9 = vpop.eup %1217 }
 0x368   :  { %v1220_v10 = vpop.eup %1219 }
 0x369   :  { %v1222_v11 = vpop.eup %1221  ;;  %v544_v12 = vpack.c.bf16 %v1220_v10, %v1218_v9 }
 0x36a   :  { %v1224_v13 = vpop.eup %1223 }
 0x36b   :  { %551 = vmatpush.bf16.msra.mxu3 %v544_v12  ;;  %v543_v14 = vpack.c.bf16 %v1224_v13, %v1222_v11 }
 0x36f   :  { %552 = vmatpush.bf16.msra.mxu3 %v543_v14 }
 0x372   :  { %1122 = vmatmul.msk.bf16.vlgmr.msra.gmra.mxu3 %vm176_vm0, %v1496_v44 }
 0x382   :  { %1123 = vmatmul.msk.bf16.gmra.mxu3 %vm176_vm0, %v1506_v47 }
 0x3cd   :  { %v603_v10 = vpop.permute.xlu1 %602 }
 0x3ce   :  { %v606_v11 = vsub.f32 %v603_v10, %v1688_v55 }
 0x3d0   :  { %v607_v13 = vmul.f32 %v606_v11, %v1543_v32 }
 0x3f5   :  { %v554_v15 = vpop.f32.mrf.mxu3 }
 0x3f6   :  { %v555_v23 = vadd.f32 %v554_v15, %v1510_v50  ;;  %v605_v15 = vpop.permute.xlu2 %604 }
 0x3fd   :  { %v556_v17 = vpop.f32.mrf.mxu3 }
 0x3fe   :  { %v557_v21 = vadd.f32 %v556_v17, %v1512_v51  ;;  %v610_v17 = vsel %vm74_vm2, %v607_v13, %v605_v15 }
 0x400   :  { %1225 = vtanh.f32 %v557_v21  ;;  %v609_v21 = vsel %vm73_vm1, %v1547_v37, %v603_v10 }
 0x401   :  { %1227 = vtanh.f32 %v555_v23  ;;  %v617_v23 = vadd.f32 %v610_v17, %v609_v21 }
 0x405   :  { %v559_v27 = vpop.f32.mrf.mxu3 }
 0x406   :  { %v560_v28 = vadd.f32 %v559_v27, %v1515_v53  ;;  %v1226_v18 = vpop.eup %1225 }
 0x407   :  { %v1228_v36 = vpop.eup %1227  ;;  %v569_v42 = vmul.f32 %v1226_v18, %v1524_v0 }
 0x408   :  { %1229 = vtanh.f32 %v560_v28  ;;  %v568_v43 = vmul.f32 %v1228_v36, %v1521_v58  ;;  %v611_v36 = vmul.f32 %v1688_v55, %v1557_v45 }
 0x40a   :  { %v572_v26 = vadd.f32 %v569_v42, %v568_v43 }
 0x40d   :  { %v561_v34 = vpop.f32.mrf.mxu3 }
 0x40e   :  { %v562_v35 = vadd.f32 %v561_v34, %v1519_v57  ;;  %v1230_v38 = vpop.eup %1229  ;;  %v618_v34 = vmul.f32 %v617_v23, %v1559_v46 }
 0x40f   :  { %v570_v48 = vmul.f32 %v1230_v38, %v1527_v2 }
 0x410   :  { %1231 = vtanh.f32 %v562_v35  ;;  %v608_v35 = vsel %vm73_vm1, %v1555_v41, %v603_v10 }
 0x411   :  { %v573_v52 = vadd.f32 %v572_v26, %v570_v48  ;;  %v613_v42 = vadd.f32 %v610_v17, %v608_v35  ;;  %v619_v26 = vadd.f32 %v618_v34, %v611_v36 }
 0x416   :  { %v1232_v49 = vpop.eup %1231 }
 0x417   :  { %v571_v54 = vmul.f32 %v1232_v49, %v1531_v7 }
 0x419   :  { %v574_v59 = vadd.f32 %v573_v52, %v571_v54  ;;  %v614_v54 = vmul.f32 %v613_v42, %v1559_v46 }
 0x41b   :  { %v575_v60 = vrot.slane %v574_v59, 4 }
 0x41d   :  { %v576_v61 = vadd.f32 %v575_v60, %v574_v59 }
 0x41f   :  { %v577_v62 = vrot.slane %v576_v61, 2 }
 0x421   :  { %v578_v63 = vadd.f32 %v577_v62, %v576_v61  ;;  %v620_v61 = vmul.f32 %v619_v26, %v1569_v3 }
 0x423   :  { %v579_v4 = vrot.slane %v578_v63, 1 }
 0x425   :  { %v580_v5 = vadd.f32 %v579_v4, %v578_v63  ;;  %v615_v63 = vadd.f32 %v614_v54, %v611_v36 }
 0x427   :  { %v581_v6 = vadd.f32 %v580_v5, %v1536_v16  ;;  %v622_v5 = vrot.slane %v620_v61, 7 }
 0x429   :  { %v1124_v9 = vmul.f32 -1.442695, %v581_v6 }
 0x42b   :  { %1233 = vpow2.f32 %v1124_v9  ;;  %v627_v9 = vstv %s1125_s2 }
 0x431   :  { %v1234_v12 = vpop.eup %1233 }
 0x432   :  { %v585_v14 = vadd.f32 1.0, %v1234_v12 }
 0x434   :  { %1235 = vrcp.f32 %v585_v14  ;;  %v597_v38 = vand.u32 2147483648, %v585_v14  ;;  %v595_v48 = vand.u32 2147483647, %v585_v14  ;;  %vm591_vm5 = vweird.f32 %v585_v14 }
 0x436   :  { %v598_v52 = vor.u32 1.1754944e-38, %v597_v38  ;;  %vm596_vm8 = vcmp.eq.f32.partialorder %v595_v48, 8.507059e+37 }
 0x43a   :  { %v1236_v27 = vpop.eup %1235 }
 0x43b   :  { %v587_v28 = vmul.f32 %v1236_v27, %v585_v14  ;;  %vm592_vm4 = vweird.f32 %v1236_v27 }
 0x43c   :  { %vm593_vm6 = vmor %vm591_vm5, %vm592_vm4  ;;  %vm414_vm4 = vcmask 254080  }
 0x43d   :  { %v588_v18 = vsub.f32 1.0, %v587_v28 }
 0x43f   :  { %v589_v43 = vmul.f32 %v1236_v27, %v588_v18 }
 0x441   :  { %v590_v49 = vadd.f32 %v1236_v27, %v589_v43 }
 0x443   :  { %v594_v59 = vsel %vm593_vm6, %v1236_v27, %v590_v49 }
 0x444   :  { %v599_v60 = vsel %vm596_vm8, %v598_v52, %v594_v59 }
 0x445   :  { %v601_v62 = vmul.f32 %v599_v60, %v1567_v1 }
 0x447   :  { %v612_v4 = vmul.f32 %v601_v62, %v1573_v8 }
 0x449   :  { %v616_v6 = vmul.f32 %v615_v63, %v612_v4 }
 0x44b   :  { %v624_v10 = vsel %vm291_vm7, %v616_v6, %v622_v5 }
 0x44c   :  { %v628_v11 = vmul.f32 %v627_v9, %v624_v10 }
 0x44e   :  { %v1741_v12 = vadd.f32 %v628_v11, %v1688_v55 }
 0x450   :  { %717 = vrot.lane.b32.xlu1 %v1741_v12, %s1349_s19  ;;  %715 = vrot.lane.b32.xlu0 %v1741_v12, %s1348_s18  ;;  %v1748_v13 = vperm.slane %v1741_v12, 0 }
 0x452   :  { %v646_v14 = vmul.f32 %v1748_v13, %v1467_v20  ;;  %v647_v15 = vmul.f32 %v1748_v13, %v1475_v25  ;;  %v644_v17 = vmul.f32 %v1748_v13, %v1470_v22  ;;  %v645_v21 = vmul.f32 %v1748_v13, %v1480_v29 }
 0x454   :  { %v650_v23 = vadd.f32 %v646_v14, %v1465_v19  ;;  %v651_v27 = vadd.f32 %v647_v15, %v1473_v24  ;;  %v648_v28 = vadd.f32 %v644_v17, %v1486_v33  ;;  %v649_v34 = vadd.f32 %v645_v21, %v1483_v31 }
 0x456   :  { %1237 = vtanh.f32 %v650_v23 }
 0x457   :  { %1239 = vtanh.f32 %v651_v27 }
 0x458   :  { %1241 = vtanh.f32 %v648_v28 }
 0x459   :  { %1243 = vtanh.f32 %v649_v34 }
 0x45c   :  { %v1238_v18 = vpop.eup %1237 }
 0x45d   :  { %v1240_v35 = vpop.eup %1239 }
 0x45e   :  { %v1242_v36 = vpop.eup %1241  ;;  %v657_v38 = vpack.c.bf16 %v1240_v35, %v1238_v18 }
 0x45f   :  { %v1244_v42 = vpop.eup %1243 }
 0x460   :  { %664 = vmatpush.bf16.msrb.mxu0 %v657_v38  ;;  %v656_v43 = vpack.c.bf16 %v1244_v42, %v1242_v36 }
 0x464   :  { %665 = vmatpush.bf16.msrb.mxu0 %v656_v43 }
 0x467   :  { %1126 = vmatmul.msk.bf16.vlgmr.msrb.gmra.mxu0 %vm176_vm0, %v1496_v44 }
 0x477   :  { %1127 = vmatmul.msk.bf16.gmra.mxu0 %vm176_vm0, %v1506_v47 }
 0x4c2   :  { %v716_v38 = vpop.permute.xlu0 %715 }
 0x4c3   :  { %v719_v42 = vsub.f32 %v716_v38, %v1741_v12 }
 0x4e4   :  { %v667_v48 = vpop.f32.mrf.mxu0 }
 0x4e5   :  { %v668_v52 = vadd.f32 %v667_v48, %v1510_v50  ;;  %v720_v48 = vmul.f32 %v719_v42, %v1543_v32  ;;  %v740_v42 = vstv %s1129_s7 }
 0x4ec   :  { %v669_v26 = vpop.f32.mrf.mxu0 }
 0x4ed   :  { %v670_v49 = vadd.f32 %v669_v26, %v1512_v51 }
 0x4ef   :  { %1245 = vtanh.f32 %v670_v49  ;;  %v718_v49 = vpop.permute.xlu1 %717 }
 0x4f0   :  { %1247 = vtanh.f32 %v668_v52  ;;  %v723_v52 = vsel %vm74_vm2, %v720_v48, %v718_v49 }
 0x4f4   :  { %v672_v54 = vpop.f32.mrf.mxu0 }
 0x4f5   :  { %v673_v59 = vadd.f32 %v672_v54, %v1515_v53  ;;  %v1246_v61 = vpop.eup %1245  ;;  %v722_v54 = vsel %vm73_vm1, %v1547_v37, %v716_v38 }
 0x4f6   :  { %v1248_v63 = vpop.eup %1247  ;;  %v682_v5 = vmul.f32 %v1246_v61, %v1524_v0 }
 0x4f7   :  { %1249 = vtanh.f32 %v673_v59  ;;  %v681_v6 = vmul.f32 %v1248_v63, %v1521_v58  ;;  %v730_v59 = vadd.f32 %v723_v52, %v722_v54 }
 0x4f9   :  { %v685_v10 = vadd.f32 %v682_v5, %v681_v6  ;;  %v724_v5 = vmul.f32 %v1741_v12, %v1557_v45 }
 0x4fc   :  { %v674_v60 = vpop.f32.mrf.mxu0 }
 0x4fd   :  { %v675_v62 = vadd.f32 %v674_v60, %v1519_v57  ;;  %v1250_v4 = vpop.eup %1249 }
 0x4fe   :  { %v683_v9 = vmul.f32 %v1250_v4, %v1527_v2  ;;  %v721_v4 = vsel %vm73_vm1, %v1555_v41, %v716_v38 }
 0x4ff   :  { %1251 = vtanh.f32 %v675_v62  ;;  %v731_v62 = vmul.f32 %v730_v59, %v1559_v46 }
 0x500   :  { %v686_v14 = vadd.f32 %v685_v10, %v683_v9  ;;  %v726_v9 = vadd.f32 %v723_v52, %v721_v4 }
 0x505   :  { %v1252_v11 = vpop.eup %1251 }
 0x506   :  { %v684_v15 = vmul.f32 %v1252_v11, %v1531_v7 }
 0x508   :  { %v687_v17 = vadd.f32 %v686_v14, %v684_v15  ;;  %v732_v14 = vadd.f32 %v731_v62, %v724_v5 }
 0x50a   :  { %v688_v21 = vrot.slane %v687_v17, 4 }
 0x50c   :  { %v689_v23 = vadd.f32 %v688_v21, %v687_v17  ;;  %v727_v21 = vmul.f32 %v726_v9, %v1559_v46 }
 0x50e   :  { %v690_v27 = vrot.slane %v689_v23, 2 }
 0x510   :  { %v691_v28 = vadd.f32 %v690_v27, %v689_v23 }
 0x512   :  { %v692_v34 = vrot.slane %v691_v28, 1 }
 0x514   :  { %v693_v18 = vadd.f32 %v692_v34, %v691_v28  ;;  %v733_v28 = vmul.f32 %v732_v14, %v1569_v3 }
 0x516   :  { %v694_v35 = vadd.f32 %v693_v18, %v1536_v16  ;;  %v728_v18 = vadd.f32 %v727_v21, %v724_v5 }
 0x518   :  { %v1128_v36 = vmul.f32 -1.442695, %v694_v35 }
 0x51a   :  { %1253 = vpow2.f32 %v1128_v36  ;;  %v735_v36 = vrot.slane %v733_v28, 7 }
 0x520   :  { %v1254_v43 = vpop.eup %1253 }
 0x521   :  { %v698_v26 = vadd.f32 1.0, %v1254_v43 }
 0x523   :  { %1255 = vrcp.f32 %v698_v26  ;;  %v710_v6 = vand.u32 2147483648, %v698_v26  ;;  %v708_v11 = vand.u32 2147483647, %v698_v26  ;;  %vm704_vm10 = vweird.f32 %v698_v26 }
 0x525   :  { %v711_v17 = vor.u32 1.1754944e-38, %v710_v6  ;;  %vm709_vm12 = vcmp.eq.f32.partialorder %v708_v11, 8.507059e+37 }
 0x529   :  { %v1256_v60 = vpop.eup %1255 }
 0x52a   :  { %v700_v61 = vmul.f32 %v1256_v60, %v698_v26  ;;  %vm705_vm9 = vweird.f32 %v1256_v60 }
 0x52b   :  { %vm706_vm11 = vmor %vm704_vm10, %vm705_vm9  ;;  %vm866_vm10 = vcmask 778880  }
 0x52c   :  { %v701_v63 = vsub.f32 1.0, %v700_v61 }
 0x52e   :  { %v702_v10 = vmul.f32 %v1256_v60, %v701_v63 }
 0x530   :  { %v703_v15 = vadd.f32 %v1256_v60, %v702_v10 }
 0x532   :  { %v707_v23 = vsel %vm706_vm11, %v1256_v60, %v703_v15  ;;  %vm979_vm11 = vcmask 910080  }
 0x533   :  { %v712_v27 = vsel %vm709_vm12, %v711_v17, %v707_v23 }
 0x534   :  { %v714_v34 = vmul.f32 %v712_v27, %v1567_v1 }
 0x536   :  { %v725_v35 = vmul.f32 %v714_v34, %v1573_v8 }
 0x538   :  { %v729_v38 = vmul.f32 %v728_v18, %v725_v35 }
 0x53a   :  { %v737_v43 = vsel %vm291_vm7, %v729_v38, %v735_v36 }
 0x53b   :  { %v741_v48 = vmul.f32 %v740_v42, %v737_v43 }
 0x53d   :  { %v1794_v26 = vadd.f32 %v741_v48, %v1741_v12 }
 0x53f   :  { %830 = vrot.lane.b32.xlu0 %v1794_v26, %s1349_s19  ;;  %828 = vrot.lane.b32.xlu2 %v1794_v26, %s1348_s18  ;;  %v1801_v49 = vperm.slane %v1794_v26, 0 }
 0x541   :  { %v759_v52 = vmul.f32 %v1801_v49, %v1467_v20  ;;  %v760_v54 = vmul.f32 %v1801_v49, %v1475_v25  ;;  %v757_v59 = vmul.f32 %v1801_v49, %v1470_v22  ;;  %v758_v60 = vmul.f32 %v1801_v49, %v1480_v29 }
 0x543   :  { %v763_v61 = vadd.f32 %v759_v52, %v1465_v19  ;;  %v764_v62 = vadd.f32 %v760_v54, %v1473_v24  ;;  %v761_v63 = vadd.f32 %v757_v59, %v1486_v33  ;;  %v762_v4 = vadd.f32 %v758_v60, %v1483_v31 }
 0x545   :  { %1257 = vtanh.f32 %v763_v61 }
 0x546   :  { %1259 = vtanh.f32 %v764_v62 }
 0x547   :  { %1261 = vtanh.f32 %v761_v63 }
 0x548   :  { %1263 = vtanh.f32 %v762_v4 }
 0x54b   :  { %v1258_v5 = vpop.eup %1257 }
 0x54c   :  { %v1260_v6 = vpop.eup %1259 }
 0x54d   :  { %v1262_v9 = vpop.eup %1261  ;;  %v770_v10 = vpack.c.bf16 %v1260_v6, %v1258_v5 }
 0x54e   :  { %v1264_v11 = vpop.eup %1263 }
 0x54f   :  { %777 = vmatpush.bf16.msrb.mxu1 %v770_v10  ;;  %v769_v14 = vpack.c.bf16 %v1264_v11, %v1262_v9 }
 0x553   :  { %778 = vmatpush.bf16.msrb.mxu1 %v769_v14 }
 0x556   :  { %1130 = vmatmul.msk.bf16.vlgmr.msrb.gmra.mxu1 %vm176_vm0, %v1496_v44 }
 0x566   :  { %1131 = vmatmul.msk.bf16.gmra.mxu1 %vm176_vm0, %v1506_v47 }
 0x599   :  { %v829_v14 = vpop.permute.xlu2 %828 }
 0x5d3   :  { %v780_v15 = vpop.f32.mrf.mxu1 }
 0x5d4   :  { %v781_v23 = vadd.f32 %v780_v15, %v1510_v50  ;;  %v832_v15 = vsub.f32 %v829_v14, %v1794_v26 }
 0x5db   :  { %v782_v17 = vpop.f32.mrf.mxu1 }
 0x5dc   :  { %v783_v21 = vadd.f32 %v782_v17, %v1512_v51 }
 0x5de   :  { %1265 = vtanh.f32 %v783_v21 }
 0x5df   :  { %1267 = vtanh.f32 %v781_v23  ;;  %v831_v23 = vpop.permute.xlu0 %830 }
 0x5e3   :  { %v785_v27 = vpop.f32.mrf.mxu1 }
 0x5e4   :  { %v786_v28 = vadd.f32 %v785_v27, %v1515_v53  ;;  %v1266_v18 = vpop.eup %1265  ;;  %v833_v27 = vmul.f32 %v832_v15, %v1543_v32 }
 0x5e5   :  { %v1268_v36 = vpop.eup %1267  ;;  %v795_v42 = vmul.f32 %v1266_v18, %v1524_v0 }
 0x5e6   :  { %1269 = vtanh.f32 %v786_v28  ;;  %v794_v43 = vmul.f32 %v1268_v36, %v1521_v58  ;;  %v836_v28 = vsel %vm74_vm2, %v833_v27, %v831_v23  ;;  %v853_v23 = vstv %s1133_s20 }
 0x5e8   :  { %v798_v52 = vadd.f32 %v795_v42, %v794_v43  ;;  %v834_v43 = vsel %vm73_vm1, %v1555_v41, %v829_v14 }
 0x5eb   :  { %v787_v34 = vpop.f32.mrf.mxu1 }
 0x5ec   :  { %v788_v35 = vadd.f32 %v787_v34, %v1519_v57  ;;  %v1270_v38 = vpop.eup %1269  ;;  %v835_v34 = vsel %vm73_vm1, %v1547_v37, %v829_v14 }
 0x5ed   :  { %v796_v48 = vmul.f32 %v1270_v38, %v1527_v2  ;;  %v843_v18 = vadd.f32 %v836_v28, %v835_v34 }
 0x5ee   :  { %1271 = vtanh.f32 %v788_v35 }
 0x5ef   :  { %v799_v59 = vadd.f32 %v798_v52, %v796_v48  ;;  %v844_v38 = vmul.f32 %v843_v18, %v1559_v46  ;;  %v837_v48 = vmul.f32 %v1794_v26, %v1557_v45 }
 0x5f4   :  { %v1272_v54 = vpop.eup %1271 }
 0x5f5   :  { %v797_v60 = vmul.f32 %v1272_v54, %v1531_v7  ;;  %v839_v54 = vadd.f32 %v836_v28, %v834_v43 }
 0x5f7   :  { %v800_v61 = vadd.f32 %v799_v59, %v797_v60 }
 0x5f9   :  { %v801_v62 = vrot.slane %v800_v61, 4 }
 0x5fb   :  { %v802_v63 = vadd.f32 %v801_v62, %v800_v61  ;;  %v845_v61 = vadd.f32 %v844_v38, %v837_v48 }
 0x5fd   :  { %v803_v4 = vrot.slane %v802_v63, 2 }
 0x5ff   :  { %v804_v5 = vadd.f32 %v803_v4, %v802_v63  ;;  %v840_v4 = vmul.f32 %v839_v54, %v1559_v46  ;;  %v518_v54 = vrot.slane %v1688_v55, 1 }
 0x601   :  { %v805_v6 = vrot.slane %v804_v5, 1 }
 0x603   :  { %v806_v9 = vadd.f32 %v805_v6, %v804_v5 }
 0x605   :  { %v807_v10 = vadd.f32 %v806_v9, %v1536_v16  ;;  %v846_v9 = vmul.f32 %v845_v61, %v1569_v3 }
 0x607   :  { %v1132_v11 = vmul.f32 -1.442695, %v807_v10  ;;  %v848_v15 = vrot.slane %v846_v9, 7 }
 0x609   :  { %1273 = vpow2.f32 %v1132_v11  ;;  %v841_v11 = vadd.f32 %v840_v4, %v837_v48 }
 0x60f   :  { %v1274_v17 = vpop.eup %1273 }
 0x610   :  { %v811_v21 = vadd.f32 1.0, %v1274_v17 }
 0x612   :  { %1275 = vrcp.f32 %v811_v21  ;;  %v823_v52 = vand.u32 2147483648, %v811_v21  ;;  %v821_v60 = vand.u32 2147483647, %v811_v21  ;;  %vm817_vm14 = vweird.f32 %v811_v21 }
 0x614   :  { %v824_v63 = vor.u32 1.1754944e-38, %v823_v52  ;;  %vm822_vm3 = vcmp.eq.f32.partialorder %v821_v60, 8.507059e+37 }
 0x618   :  { %v1276_v35 = vpop.eup %1275 }
 0x619   :  { %v813_v36 = vmul.f32 %v1276_v35, %v811_v21  ;;  %vm818_vm13 = vweird.f32 %v1276_v35 }
 0x61a   :  { %vm819_vm15 = vmor %vm817_vm14, %vm818_vm13 }
 0x61b   :  { %v814_v42 = vsub.f32 1.0, %v813_v36 }
 0x61d   :  { %v815_v59 = vmul.f32 %v1276_v35, %v814_v42 }
 0x61f   :  { %v816_v62 = vadd.f32 %v1276_v35, %v815_v59 }
 0x621   :  { %v820_v5 = vsel %vm819_vm15, %v1276_v35, %v816_v62 }
 0x622   :  { %v825_v6 = vsel %vm822_vm3, %v824_v63, %v820_v5  ;;  %v520_v63 = vperm.slane %v518_v54, 0  ;;  %vm1092_vm3 = vcmask 1041280  }
 0x623   :  { %v827_v10 = vmul.f32 %v825_v6, %v1567_v1 }
 0x625   :  { %v838_v14 = vmul.f32 %v827_v10, %v1573_v8 }
 0x627   :  { %v842_v17 = vmul.f32 %v841_v11, %v838_v14 }
 0x629   :  { %v850_v21 = vsel %vm291_vm7, %v842_v17, %v848_v15 }
 0x62a   :  { %v854_v27 = vmul.f32 %v853_v23, %v850_v21 }
 0x62c   :  { %v1847_v28 = vadd.f32 %v854_v27, %v1794_v26 }
 0x62e   :  { %943 = vrot.lane.b32.xlu2 %v1847_v28, %s1349_s19  ;;  %941 = vrot.lane.b32.xlu1 %v1847_v28, %s1348_s18  ;;  %v1854_v34 = vperm.slane %v1847_v28, 0 }
 0x630   :  { %v872_v18 = vmul.f32 %v1854_v34, %v1467_v20  ;;  %v873_v35 = vmul.f32 %v1854_v34, %v1475_v25  ;;  %v870_v36 = vmul.f32 %v1854_v34, %v1470_v22  ;;  %v871_v38 = vmul.f32 %v1854_v34, %v1480_v29 }
 0x632   :  { %v876_v42 = vadd.f32 %v872_v18, %v1465_v19  ;;  %v877_v43 = vadd.f32 %v873_v35, %v1473_v24  ;;  %v874_v48 = vadd.f32 %v870_v36, %v1486_v33  ;;  %v875_v52 = vadd.f32 %v871_v38, %v1483_v31 }
 0x634   :  { %1277 = vtanh.f32 %v876_v42 }
 0x635   :  { %1279 = vtanh.f32 %v877_v43 }
 0x636   :  { %408 = vrot.lane.b32.xlu2 %v1642_v40, %s1350_s21  ;;  %1281 = vtanh.f32 %v874_v48  ;;  %v857_v40 = vrot.slane %v1847_v28, 1 }
 0x637   :  { %1283 = vtanh.f32 %v875_v52 }
 0x638   :  { %v859_v55 = vperm.slane %v857_v40, 0 }
 0x63a   :  { %v1278_v59 = vpop.eup %1277 }
 0x63b   :  { %v1280_v60 = vpop.eup %1279 }
 0x63c   :  { %v1282_v61 = vpop.eup %1281  ;;  %v883_v62 = vpack.c.bf16 %v1280_v60, %v1278_v59 }
 0x63d   :  { %v1284_v4 = vpop.eup %1283 }
 0x63e   :  { %890 = vmatpush.bf16.msrb.mxu2 %v883_v62  ;;  %523 = vrot.lane.b32.xlu2 %v520_v63, %s1351_s22  ;;  %v882_v5 = vpack.c.bf16 %v1284_v4, %v1282_v61 }
 0x642   :  { %891 = vmatpush.bf16.msrb.mxu2 %v882_v5 }
 0x645   :  { %1134 = vmatmul.msk.bf16.vlgmr.msrb.gmra.mxu2 %vm176_vm0, %v1496_v44 }
 0x646   :  { %747 = vrot.lane.b32.xlu2 %v1801_v49, %s1352_s23 }
 0x64e   :  { %862 = vrot.lane.b32.xlu2 %v859_v55, %s1353_s24 }
 0x655   :  { %1135 = vmatmul.msk.bf16.gmra.mxu2 %vm176_vm0, %v1506_v47 }
 0x688   :  { %v944_v6 = vpop.permute.xlu2 %943 }
 0x690   :  { %v409_v9 = vpop.permute.xlu2 %408 }
 0x691   :  { %415 = vst.msk [vmem:[%s2024_s8] sm:$0x1] %vm414_vm4, %v409_v9 }
 0x6a0   :  { %v942_v9 = vpop.permute.xlu1 %941 }
 0x6c8   :  { %v893_v10 = vpop.f32.mrf.mxu2 }
 0x6c9   :  { %v894_v14 = vadd.f32 %v893_v10, %v1510_v50  ;;  %v945_v10 = vsub.f32 %v942_v9, %v1847_v28 }
 0x6d0   :  { %v895_v11 = vpop.f32.mrf.mxu2 }
 0x6d1   :  { %v896_v49 = vadd.f32 %v895_v11, %v1512_v51 }
 0x6d3   :  { %1285 = vtanh.f32 %v896_v49  ;;  %v946_v49 = vmul.f32 %v945_v10, %v1543_v32  ;;  %v966_v10 = vstv %s1137_s26 }
 0x6d4   :  { %1287 = vtanh.f32 %v894_v14 }
 0x6d8   :  { %v898_v15 = vpop.f32.mrf.mxu2 }
 0x6d9   :  { %v899_v17 = vadd.f32 %v898_v15, %v1515_v53  ;;  %v1286_v21 = vpop.eup %1285  ;;  %v949_v15 = vsel %vm74_vm2, %v946_v49, %v944_v6 }
 0x6da   :  { %v1288_v18 = vpop.eup %1287  ;;  %v908_v36 = vmul.f32 %v1286_v21, %v1524_v0 }
 0x6db   :  { %1289 = vtanh.f32 %v899_v17  ;;  %v907_v38 = vmul.f32 %v1288_v18, %v1521_v58  ;;  %v948_v17 = vsel %vm73_vm1, %v1547_v37, %v942_v9 }
 0x6dd   :  { %v911_v43 = vadd.f32 %v908_v36, %v907_v38  ;;  %v947_v36 = vsel %vm73_vm1, %v1555_v41, %v942_v9  ;;  %v950_v38 = vmul.f32 %v1847_v28, %v1557_v45 }
 0x6e0   :  { %v900_v23 = vpop.f32.mrf.mxu2 }
 0x6e1   :  { %v901_v27 = vadd.f32 %v900_v23, %v1519_v57  ;;  %v1290_v35 = vpop.eup %1289  ;;  %v956_v23 = vadd.f32 %v949_v15, %v948_v17  ;;  %v405_v17 = vrot.slane %v1635_v39, 1  ;;  %v744_v39 = vrot.slane %v1794_v26, 1 }
 0x6e2   :  { %v909_v42 = vmul.f32 %v1290_v35, %v1527_v2 }
 0x6e3   :  { %1291 = vtanh.f32 %v901_v27  ;;  %v957_v18 = vmul.f32 %v956_v23, %v1559_v46 }
 0x6e4   :  { %v912_v52 = vadd.f32 %v911_v43, %v909_v42  ;;  %v952_v43 = vadd.f32 %v949_v15, %v947_v36 }
 0x6e9   :  { %v1292_v48 = vpop.eup %1291 }
 0x6ea   :  { %v910_v54 = vmul.f32 %v1292_v48, %v1531_v7 }
 0x6ec   :  { %v913_v59 = vadd.f32 %v912_v52, %v910_v54  ;;  %v958_v52 = vadd.f32 %v957_v18, %v950_v38 }
 0x6ee   :  { %v914_v60 = vrot.slane %v913_v59, 4 }
 0x6f0   :  { %v915_v61 = vadd.f32 %v914_v60, %v913_v59  ;;  %v953_v60 = vmul.f32 %v952_v43, %v1559_v46 }
 0x6f2   :  { %v916_v62 = vrot.slane %v915_v61, 2 }
 0x6f4   :  { %v917_v63 = vadd.f32 %v916_v62, %v915_v61 }
 0x6f6   :  { %v918_v4 = vrot.slane %v917_v63, 1 }
 0x6f8   :  { %v919_v5 = vadd.f32 %v918_v4, %v917_v63  ;;  %v959_v63 = vmul.f32 %v958_v52, %v1569_v3 }
 0x6fa   :  { %v920_v40 = vadd.f32 %v919_v5, %v1536_v16  ;;  %v954_v5 = vadd.f32 %v953_v60, %v950_v38 }
 0x6fc   :  { %v1136_v55 = vmul.f32 -1.442695, %v920_v40 }
 0x6fe   :  { %1293 = vpow2.f32 %v1136_v55  ;;  %v961_v55 = vrot.slane %v959_v63, 7 }
 0x704   :  { %v1294_v11 = vpop.eup %1293 }
 0x705   :  { %v924_v14 = vadd.f32 1.0, %v1294_v11 }
 0x707   :  { %1295 = vrcp.f32 %v924_v14  ;;  %v936_v42 = vand.u32 2147483648, %v924_v14  ;;  %v934_v48 = vand.u32 2147483647, %v924_v14  ;;  %vm930_vm6 = vweird.f32 %v924_v14 }
 0x709   :  { %v937_v59 = vor.u32 1.1754944e-38, %v936_v42  ;;  %vm935_vm9 = vcmp.eq.f32.partialorder %v934_v48, 8.507059e+37  ;;  %v407_v42 = vperm.slane %v405_v17, 0 }
 0x70d   :  { %v1296_v21 = vpop.eup %1295 }
 0x70e   :  { %v926_v27 = vmul.f32 %v1296_v21, %v924_v14  ;;  %vm931_vm5 = vweird.f32 %v1296_v21 }
 0x70f   :  { %vm932_vm8 = vmor %vm930_vm6, %vm931_vm5 }
 0x710   :  { %v927_v35 = vsub.f32 1.0, %v926_v27 }
 0x712   :  { %v928_v6 = vmul.f32 %v1296_v21, %v927_v35 }
 0x714   :  { %v929_v54 = vadd.f32 %v1296_v21, %v928_v6 }
 0x716   :  { %v933_v61 = vsel %vm932_vm8, %v1296_v21, %v929_v54  ;;  %v524_v54 = vpop.permute.xlu2 %523 }
 0x717   :  { %v938_v62 = vsel %vm935_vm9, %v937_v59, %v933_v61 }
 0x718   :  { %v940_v4 = vmul.f32 %v938_v62, %v1567_v1 }
 0x71a   :  { %v951_v40 = vmul.f32 %v940_v4, %v1573_v8 }
 0x71c   :  { %v955_v9 = vmul.f32 %v954_v5, %v951_v40 }
 0x71e   :  { %v963_v11 = vsel %vm291_vm7, %v955_v9, %v961_v55  ;;  %v748_v30 = vpop.permute.xlu2 %747 }
 0x71f   :  { %v967_v49 = vmul.f32 %v966_v10, %v963_v11 }
 0x721   :  { %v1912_v14 = vadd.f32 %v967_v49, %v1847_v28 }
 0x723   :  { %1056 = vrot.lane.b32.xlu1 %v1912_v14, %s1349_s19  ;;  %1054 = vrot.lane.b32.xlu0 %v1912_v14, %s1348_s18  ;;  %v971_v15 = vperm.slane %v1912_v14, 0  ;;  %s1354_s18 = smov 48   ;;  %s1355_s19 = smov 96  }
 0x725   :  { %v985_v23 = vmul.f32 %v971_v15, %v1467_v20  ;;  %v986_v21 = vmul.f32 %v971_v15, %v1475_v25  ;;  %v983_v27 = vmul.f32 %v971_v15, %v1470_v22  ;;  %v984_v18 = vmul.f32 %v971_v15, %v1480_v29 }
 0x726   :  { %v631_v20 = vrot.slane %v1741_v12, 1  ;;  %v970_v12 = vrot.slane %v1912_v14, 1  ;;  %v863_v63 = vpop.permute.xlu2 %862 }
 0x727   :  { %v989_v28 = vadd.f32 %v985_v23, %v1465_v19  ;;  %v990_v35 = vadd.f32 %v986_v21, %v1473_v24  ;;  %v987_v36 = vadd.f32 %v983_v27, %v1486_v33  ;;  %v988_v38 = vadd.f32 %v984_v18, %v1483_v31 }
 0x728   :  { %v633_v29 = vperm.slane %v631_v20, 0  ;;  %v972_v43 = vperm.slane %v970_v12, 0 }
 0x729   :  { %1297 = vtanh.f32 %v989_v28 }
 0x72a   :  { %1299 = vtanh.f32 %v990_v35 }
 0x72b   :  { %521 = vrot.lane.b32.xlu1 %v1695_v56, %s1351_s22  ;;  %410 = vrot.lane.b32.xlu0 %v407_v42, %s1350_s21  ;;  %1301 = vtanh.f32 %v987_v36  ;;  %v746_v56 = vperm.slane %v744_v39, 0  ;;  %s1141_s22 = sld [smem:[#allocation5 + $0x7]] }
 0x72c   :  { %1303 = vtanh.f32 %v988_v38 }
 0x72f   :  { %v1298_v22 = vpop.eup %1297 }
 0x730   :  { %v1300_v19 = vpop.eup %1299 }
 0x731   :  { %v1302_v25 = vpop.eup %1301  ;;  %v996_v24 = vpack.c.bf16 %v1300_v19, %v1298_v22 }
 0x732   :  { %v1304_v33 = vpop.eup %1303 }
 0x733   :  { %1003 = vmatpush.bf16.msrb.mxu3 %v996_v24  ;;  %636 = vrot.lane.b32.xlu1 %v633_v29, %s1354_s18  ;;  %v995_v31 = vpack.c.bf16 %v1304_v33, %v1302_v25 }
 0x734   :  { %634 = vrot.lane.b32.xlu0 %v1748_v13, %s1354_s18 }
 0x737   :  { %1004 = vmatpush.bf16.msrb.mxu3 %v995_v31 }
 0x73a   :  { %1138 = vmatmul.msk.bf16.vlgmr.msrb.gmra.mxu3 %vm176_vm0, %v1496_v44 }
 0x73b   :  { %860 = vrot.lane.b32.xlu1 %v1854_v34, %s1353_s24 }
 0x73c   :  { %749 = vrot.lane.b32.xlu0 %v746_v56, %s1352_s23  ;;  %v1063_v56 = vmul.f32 %v1912_v14, %v1557_v45  ;;  %s1356_s23 = smov 112  }
 0x743   :  { %975 = vrot.lane.b32.xlu1 %v972_v43, %s1355_s19 }
 0x744   :  { %973 = vrot.lane.b32.xlu0 %v971_v15, %s1355_s19 }
 0x74a   :  { %1139 = vmatmul.msk.bf16.gmra.mxu3 %vm176_vm0, %v1506_v47  ;;  %vm527_vm0 = vcmask 385280  }
 0x795   :  { %v1057_v13 = vpop.permute.xlu1 %1056  ;;  %v1055_v26 = vpop.permute.xlu0 %1054 }
 0x796   :  { %v1058_v6 = vsub.f32 %v1055_v26, %v1912_v14  ;;  %v1060_v34 = vsel %vm73_vm1, %v1555_v41, %v1055_v26  ;;  %v1061_v48 = vsel %vm73_vm1, %v1547_v37, %v1055_v26  ;;  %vm640_vm1 = vcmask 516480  }
 0x798   :  { %v1059_v44 = vmul.f32 %v1058_v6, %v1543_v32 }
 0x79a   :  { %v1062_v52 = vsel %vm74_vm2, %v1059_v44, %v1057_v13  ;;  %vm753_vm2 = vcmask 647680  }
 0x79b   :  { %v1952_v59 = vadd.f32 %v1062_v52, %v1060_v34  ;;  %v1954_v47 = vadd.f32 %v1062_v52, %v1061_v48 }
 0x79d   :  { %v522_v60 = vpop.permute.xlu1 %521  ;;  %v411_v61 = vpop.permute.xlu0 %410  ;;  %v1070_v31 = vmul.f32 %v1954_v47, %v1559_v46  ;;  %v1066_v6 = vmul.f32 %v1952_v59, %v1559_v46 }
 0x79e   :  { %528 = vst.msk [vmem:[%s2024_s8] sm:$0x1] %vm527_vm0, %v522_v60 }
 0x79f   :  { %416 = vst.msk [vmem:[%s2024_s8 + $0x1] sm:$0x1] %vm414_vm4, %v411_v61  ;;  %v1071_v13 = vadd.f32 %v1070_v31, %v1063_v56  ;;  %v1067_v45 = vadd.f32 %v1066_v6, %v1063_v56  ;;  %v1079_v61 = vstv %s1141_s22 }
 0x7a0   :  { %529 = vst.msk [vmem:[%s2024_s8 + $0x1] sm:$0x1] %vm527_vm0, %v524_v54 }
 0x7a1   :  { %v1072_v48 = vmul.f32 %v1071_v13, %v1569_v3 }
 0x7a3   :  { %v1074_v47 = vrot.slane %v1072_v48, 7 }
 0x7a5   :  { %v637_v32 = vpop.permute.xlu1 %636 }
 0x7a6   :  { %642 = vst.msk [vmem:[%s2024_s8 + $0x1] sm:$0x1] %vm640_vm1, %v637_v32  ;;  %v635_v37 = vpop.permute.xlu0 %634 }
 0x7a7   :  { %641 = vst.msk [vmem:[%s2024_s8] sm:$0x1] %vm640_vm1, %v635_v37 }
 0x7a8   :  { %754 = vst.msk [vmem:[%s2024_s8] sm:$0x1] %vm753_vm2, %v748_v30 }
 0x7ad   :  { %v861_v41 = vpop.permute.xlu1 %860 }
 0x7ae   :  { %867 = vst.msk [vmem:[%s2024_s8] sm:$0x1] %vm866_vm10, %v861_v41  ;;  %v750_v62 = vpop.permute.xlu0 %749 }
 0x7af   :  { %755 = vst.msk [vmem:[%s2024_s8 + $0x1] sm:$0x1] %vm753_vm2, %v750_v62 }
 0x7b0   :  { %868 = vst.msk [vmem:[%s2024_s8 + $0x1] sm:$0x1] %vm866_vm10, %v863_v63 }
 0x7b5   :  { %v976_v4 = vpop.permute.xlu1 %975 }
 0x7b6   :  { %981 = vst.msk [vmem:[%s2024_s8 + $0x1] sm:$0x1] %vm979_vm11, %v976_v4  ;;  %v974_v5 = vpop.permute.xlu0 %973 }
 0x7b7   :  { %980 = vst.msk [vmem:[%s2024_s8] sm:$0x1] %vm979_vm11, %v974_v5 }
 0x7bd   :  { %v1006_v40 = vpop.f32.mrf.mxu3 }
 0x7be   :  { %v1007_v10 = vadd.f32 %v1006_v40, %v1510_v50 }
 0x7c5   :  { %v1008_v55 = vpop.f32.mrf.mxu3 }
 0x7c6   :  { %v1009_v9 = vadd.f32 %v1008_v55, %v1512_v51 }
 0x7c8   :  { %1305 = vtanh.f32 %v1009_v9 }
 0x7c9   :  { %1307 = vtanh.f32 %v1007_v10 }
 0x7cd   :  { %v1011_v11 = vpop.f32.mrf.mxu3 }
 0x7ce   :  { %v1012_v49 = vadd.f32 %v1011_v11, %v1515_v53  ;;  %v1306_v17 = vpop.eup %1305 }
 0x7cf   :  { %v1308_v21 = vpop.eup %1307  ;;  %v1021_v18 = vmul.f32 %v1306_v17, %v1524_v0 }
 0x7d0   :  { %1309 = vtanh.f32 %v1012_v49  ;;  %v1020_v28 = vmul.f32 %v1308_v21, %v1521_v58 }
 0x7d2   :  { %v1024_v50 = vadd.f32 %v1021_v18, %v1020_v28 }
 0x7d5   :  { %v1013_v15 = vpop.f32.mrf.mxu3 }
 0x7d6   :  { %v1014_v23 = vadd.f32 %v1013_v15, %v1519_v57  ;;  %v1310_v27 = vpop.eup %1309 }
 0x7d7   :  { %v1022_v51 = vmul.f32 %v1310_v27, %v1527_v2 }
 0x7d8   :  { %1311 = vtanh.f32 %v1014_v23 }
 0x7d9   :  { %v1025_v36 = vadd.f32 %v1024_v50, %v1022_v51 }
 0x7de   :  { %v1312_v35 = vpop.eup %1311 }
 0x7df   :  { %v1023_v53 = vmul.f32 %v1312_v35, %v1531_v7 }
 0x7e1   :  { %v1026_v38 = vadd.f32 %v1025_v36, %v1023_v53 }
 0x7e3   :  { %v1027_v42 = vrot.slane %v1026_v38, 4 }
 0x7e5   :  { %v1028_v20 = vadd.f32 %v1027_v42, %v1026_v38 }
 0x7e7   :  { %v1029_v22 = vrot.slane %v1028_v20, 2 }
 0x7e9   :  { %v1030_v19 = vadd.f32 %v1029_v22, %v1028_v20 }
 0x7eb   :  { %v1031_v57 = vrot.slane %v1030_v19, 1 }
 0x7ed   :  { %v1032_v25 = vadd.f32 %v1031_v57, %v1030_v19 }
 0x7ef   :  { %v1033_v24 = vadd.f32 %v1032_v25, %v1536_v16 }
 0x7f1   :  { %v1140_v29 = vmul.f32 -1.442695, %v1033_v24 }
 0x7f3   :  { %1313 = vpow2.f32 %v1140_v29 }
 0x7f9   :  { %v1314_v0 = vpop.eup %1313 }
 0x7fa   :  { %v1037_v58 = vadd.f32 1.0, %v1314_v0 }
 0x7fc   :  { %1315 = vrcp.f32 %v1037_v58  ;;  %v1049_v39 = vand.u32 2147483648, %v1037_v58  ;;  %v1047_v43 = vand.u32 2147483647, %v1037_v58  ;;  %vm1043_vm13 = vweird.f32 %v1037_v58 }
 0x7fe   :  { %v1050_v26 = vor.u32 1.1754944e-38, %v1049_v39  ;;  %vm1048_vm15 = vcmp.eq.f32.partialorder %v1047_v43, 8.507059e+37 }
 0x802   :  { %v1316_v2 = vpop.eup %1315 }
 0x803   :  { %v1039_v33 = vmul.f32 %v1316_v2, %v1037_v58  ;;  %vm1044_vm12 = vweird.f32 %v1316_v2 }
 0x804   :  { %vm1045_vm14 = vmor %vm1043_vm13, %vm1044_vm12 }
 0x805   :  { %v1040_v7 = vsub.f32 1.0, %v1039_v33 }
 0x807   :  { %v1041_v12 = vmul.f32 %v1316_v2, %v1040_v7 }
 0x809   :  { %v1042_v16 = vadd.f32 %v1316_v2, %v1041_v12 }
 0x80b   :  { %v1046_v44 = vsel %vm1045_vm14, %v1316_v2, %v1042_v16 }
 0x80c   :  { %v1051_v34 = vsel %vm1048_vm15, %v1050_v26, %v1046_v44 }
 0x80d   :  { %v1053_v52 = vmul.f32 %v1051_v34, %v1567_v1 }
 0x80f   :  { %v1064_v54 = vmul.f32 %v1053_v52, %v1573_v8 }
 0x811   :  { %v1068_v60 = vmul.f32 %v1067_v45, %v1064_v54 }
 0x813   :  { %v1076_v30 = vsel %vm291_vm7, %v1068_v60, %v1074_v47 }
 0x814   :  { %v1080_v32 = vmul.f32 %v1079_v61, %v1076_v30 }
 0x816   :  { %v1081_v37 = vadd.f32 %v1080_v32, %v1912_v14 }
 0x818   :  { %v1084_v41 = vperm.slane %v1081_v37, 0  ;;  %1095 = vst [vmem:[#allocation2] sm:$0x3] %v1081_v37  ;;  %v1083_v46 = vrot.slane %v1081_v37, 1 }
 0x81a   :  { %1086 = vrot.lane.b32.xlu2 %v1084_v41, %s1356_s23  ;;  %v1085_v59 = vperm.slane %v1083_v46, 0 }
 0x81c   :  { %1088 = vrot.lane.b32.xlu0 %v1085_v59, %s1356_s23 }
 0x874   :  { %v1087_v1 = vpop.permute.xlu2 %1086 }
 0x875   :  { %1093 = vst.msk [vmem:[%s2024_s8] sm:$0x1] %vm1092_vm3, %v1087_v1 }
 0x88e   :  { %v1089_v3 = vpop.permute.xlu0 %1088 }
 0x88f   :  { %1094 = vst.msk [vmem:[%s2024_s8 + $0x1] sm:$0x1] %vm1092_vm3, %v1089_v3 }
 0x890   :  { %1100 = vsyncpa [#allocation4], 1 }
 0x891   :  { %1101 = vsyncpa [#allocation6], 1 }

</bundles_post_ra>
